<compile_context>
chip_gen: v5e
topology: v5e:2x2
jax: 0.10.0
libtpu: 0.0.40
codegen_flags: <defaults>
</compile_context>

<pallas_src>
import functools

import numpy as np
import jax
import jax.numpy as jnp
from jax.experimental import pallas as pl
from jax.experimental.pallas import tpu as pltpu

ATTN_MASK_FILL = -1e4  # additive mask fill value used by the reference model


def _round_up(x, m):
    return ((x + m - 1) // m) * m


def _pad_to(x, shape):
    pads = [(0, s - d) for d, s in zip(x.shape, shape)]
    if any(p[1] for p in pads):
        return jnp.pad(x, pads)
    return x


# ----------------------------------------------------------------------------
# Tiled linear (matmul + bias [+ activation] epilogue)
# ----------------------------------------------------------------------------

def _linear_kernel(x_ref, w_ref, b_ref, o_ref, acc_ref, *, activation):
    @pl.when(pl.program_id(2) == 0)
    def _init():
        acc_ref[...] = jnp.zeros_like(acc_ref)

    acc_ref[...] += jnp.dot(x_ref[...], w_ref[...],
                            preferred_element_type=jnp.float32)

    @pl.when(pl.program_id(2) == pl.num_programs(2) - 1)
    def _finalize():
        y = acc_ref[...] + b_ref[...]
        if activation == 'gelu':
            y = jax.nn.gelu(y)
        elif activation == 'tanh':
            y = jnp.tanh(y)
        o_ref[...] = y.astype(o_ref.dtype)


def _pick_tiles(M, N, K):
    # Caps chosen so 2 (double-buffered) bf16 input tiles + f32 accumulator stay well under the
    # tightest scoped-VMEM budget (v5e 16 MiB); 256/512 are MXU-friendly on v6e/v7x, 128-multiples
    # on v5e.
    tm = min(256, _round_up(M, 8))
    tn = min(256, _round_up(N, 128))
    tk = min(512, _round_up(K, 128))
    return tm, tn, tk


def linear(x, w, b, activation=None):
    """y = act(x @ w + b).  x: (..., K), w: (K, N), b: (N,)."""
    lead = x.shape[:-1]
    K = x.shape[-1]
    N = w.shape[1]
    M = int(np.prod(lead))
    tm, tn, tk = _pick_tiles(M, N, K)
    Mp, Np, Kp = _round_up(M, tm), _round_up(N, tn), _round_up(K, tk)

    xp = _pad_to(x.reshape(M, K).astype(jnp.float32), (Mp, Kp)).astype(jnp.bfloat16)
    wp = _pad_to(w.astype(jnp.float32), (Kp, Np)).astype(jnp.bfloat16)
    bp = _pad_to(b.reshape(1, N).astype(jnp.float32), (1, Np))

    grid = (Mp // tm, Np // tn, Kp // tk)
    cost = pl.CostEstimate(
        flops=2 * Mp * Np * Kp,
        transcendentals=(Mp * Np if activation else 0),
        bytes_accessed=Mp * Kp * 2 + Kp * Np * 2 + Np * 4 + Mp * Np * 4)

    out = pl.pallas_call(
        functools.partial(_linear_kernel, activation=activation),
        grid_spec=pltpu.PrefetchScalarGridSpec(
            num_scalar_prefetch=0,
            grid=grid,
            in_specs=[pl.BlockSpec((tm, tk), lambda i, j, k: (i, k)),
                      pl.BlockSpec((tk, tn), lambda i, j, k: (k, j)),
                      pl.BlockSpec((1, tn), lambda i, j, k: (0, j))],
            out_specs=pl.BlockSpec((tm, tn), lambda i, j, k: (i, j)),
            scratch_shapes=[pltpu.VMEM((tm, tn), jnp.float32)]),
        out_shape=jax.ShapeDtypeStruct((Mp, Np), jnp.float32),
        compiler_params=pltpu.CompilerParams(
            dimension_semantics=("parallel", "parallel", "arbitrary")),
        cost_estimate=cost,
    )(xp, wp, bp)

    return out[:M, :N].reshape(*lead, N)


# ----------------------------------------------------------------------------
# Multi-head attention core: one grid step per batch element, all heads batched,
# head dim padded to 128 lanes (lane-dense I/O, unmasked stores).
# ----------------------------------------------------------------------------

def _attn_kernel(q_ref, k_ref, v_ref, *rest, has_mask):
    if has_mask:
        m_ref, o_ref = rest
    else:
        (o_ref,) = rest
    q = q_ref[0]                                   # (nh, Lq, Dp) bf16, already scaled by 1/sqrt(dh)
    k = k_ref[0]
    v = v_ref[0]
    s = jnp.einsum('hqd,hkd->hqk', q, k, preferred_element_type=jnp.float32)
    if has_mask:
        s = s + m_ref[...]                         # (1, 1, Lk) additive mask broadcast
    s = s - jnp.max(s, axis=-1, keepdims=True)
    p = jnp.exp(s)
    p = p * pl.reciprocal(jnp.sum(p, axis=-1, keepdims=True), approx=True)
    ctx = jnp.einsum('hqk,hkd->hqd', p.astype(q.dtype), v,
                     preferred_element_type=jnp.float32)
    o_ref[0] = ctx.astype(o_ref.dtype)


def attention(q, k, v, add_mask, num_heads):
    """q: (B,Lq,H); k/v: (B,Lk,H); add_mask: (B,1,Lk) additive or None.  Returns (B,Lq,H)."""
    B, Lq, H = q.shape
    Lk = k.shape[1]
    dh = H // num_heads
    Dp = _round_up(dh, 128)                        # pad head dim to lane width

    def split_pad(t, L):
        t = t.reshape(B, L, num_heads, dh).transpose(0, 2, 1, 3)
        return _pad_to(t, (B, num_heads, L, Dp)).astype(jnp.bfloat16)

    qh, kh, vh = split_pad(q, Lq), split_pad(k, Lk), split_pad(v, Lk)

    has_mask = add_mask is not None
    in_specs = [pl.BlockSpec((1, num_heads, Lq, Dp), lambda b: (b, 0, 0, 0)),
                pl.BlockSpec((1, num_heads, Lk, Dp), lambda b: (b, 0, 0, 0)),
                pl.BlockSpec((1, num_heads, Lk, Dp), lambda b: (b, 0, 0, 0))]
    args = [qh, kh, vh]
    if has_mask:
        in_specs.append(pl.BlockSpec((1, 1, Lk), lambda b: (b, 0, 0)))
        args.append(add_mask.astype(jnp.float32))

    cost = pl.CostEstimate(
        flops=4 * B * num_heads * Lq * Lk * Dp,
        transcendentals=B * num_heads * Lq * Lk,
        bytes_accessed=(qh.size + kh.size + vh.size) * 2 + B * num_heads * Lq * Dp * 4)

    ctx = pl.pallas_call(
        functools.partial(_attn_kernel, has_mask=has_mask),
        grid=(B,),
        in_specs=in_specs,
        out_specs=pl.BlockSpec((1, num_heads, Lq, Dp), lambda b: (b, 0, 0, 0)),
        out_shape=jax.ShapeDtypeStruct((B, num_heads, Lq, Dp), jnp.float32),
        compiler_params=pltpu.CompilerParams(dimension_semantics=("parallel",)),
        cost_estimate=cost,
    )(*args)

    return ctx[..., :dh].transpose(0, 2, 1, 3).reshape(B, Lq, H)


# ----------------------------------------------------------------------------
# Fused additive-attention pooling: proj = x@W+b, tanh, masked softmax, weighted sum
# all in one kernel (proj never round-trips HBM).
# ----------------------------------------------------------------------------

def _addattn_pool_kernel(x_ref, w_ref, b_ref, v_ref, m_ref, o_ref):
    x = x_ref[0]                                                        # (Lp, Hp) bf16
    proj = jnp.dot(x, w_ref[...], preferred_element_type=jnp.float32) + b_ref[...]
    h = jnp.tanh(proj)                                                  # (Lp, Hp) f32
    s = jnp.sum(h * v_ref[...], axis=-1, keepdims=True)                 # (Lp, 1)
    s = jnp.where(m_ref[0] > 0, s, ATTN_MASK_FILL)
    s = s - jnp.max(s, axis=0, keepdims=True)
    p = jnp.exp(s)
    p = p * pl.reciprocal(jnp.sum(p, axis=0, keepdims=True), approx=True)
    pooled = jnp.sum(p * x.astype(jnp.float32), axis=0, keepdims=True)  # (1, Hp)
    o_ref[0] = pooled.astype(o_ref.dtype)


def additive_attn_pool(x, w, b, v, mask):
    """x: (B,L,H), w: (H,H), b: (H,), v: (H,1), mask: (B,L) -> (B,H)."""
    B, L, H = x.shape
    Hp = _round_up(H, 128)
    Lp = _round_up(L, 8)
    xp = _pad_to(x.astype(jnp.float32), (B, Lp, Hp)).astype(jnp.bfloat16)
    wp = _pad_to(w.astype(jnp.float32), (Hp, Hp)).astype(jnp.bfloat16)
    bp = _pad_to(b.reshape(1, H).astype(jnp.float32), (1, Hp))
    vp = _pad_to(v.reshape(1, H).astype(jnp.float32), (1, Hp))
    mp = _pad_to(mask.astype(jnp.float32).reshape(B, L, 1), (B, Lp, 1))

    cost = pl.CostEstimate(
        flops=2 * B * Lp * Hp * Hp + 4 * B * Lp * Hp,
        transcendentals=B * Lp * (Hp + 1),
        bytes_accessed=xp.size * 2 + wp.size * 2 + B * Hp * 4)

    out = pl.pallas_call(
        _addattn_pool_kernel,
        grid=(B,),
        in_specs=[pl.BlockSpec((1, Lp, Hp), lambda i: (i, 0, 0)),
                  pl.BlockSpec((Hp, Hp), lambda i: (0, 0)),
                  pl.BlockSpec((1, Hp), lambda i: (0, 0)),
                  pl.BlockSpec((1, Hp), lambda i: (0, 0)),
                  pl.BlockSpec((1, Lp, 1), lambda i: (i, 0, 0))],
        out_specs=pl.BlockSpec((1, 1, Hp), lambda i: (i, 0, 0)),
        out_shape=jax.ShapeDtypeStruct((B, 1, Hp), jnp.float32),
        compiler_params=pltpu.CompilerParams(dimension_semantics=("parallel",)),
        cost_estimate=cost,
    )(xp, wp, bp, vp, mp)
    return out[:, 0, :H]


# ----------------------------------------------------------------------------
# Model building blocks (JAX glue around the Pallas kernels)
# ----------------------------------------------------------------------------

def layer_norm(x, gamma, beta, eps=1e-5):
    mu = jnp.mean(x, axis=-1, keepdims=True)
    var = jnp.mean((x - mu) ** 2, axis=-1, keepdims=True)
    return (x - mu) * jax.lax.rsqrt(var + eps) * gamma + beta


def mha(q_in, kv_in, add_mask, p, num_heads):
    """Multi-head attention.  q_in: (B,Lq,H); kv_in: (B,Lk,H); add_mask: (B,1,Lk) or None."""
    H = q_in.shape[-1]
    dh = H // num_heads
    scale = 1.0 / float(np.sqrt(dh))
    wq = p['wq'] * scale                              # fold 1/sqrt(dh) into the q projection
    bq = p['bq'] * scale
    if q_in is kv_in:
        # fused QKV projection (one tiled matmul instead of three pallas_calls)
        w_qkv = jnp.concatenate([wq, p['wk'], p['wv']], axis=1)
        b_qkv = jnp.concatenate([bq, p['bk'], p['bv']], axis=0)
        qkv = linear(q_in, w_qkv, b_qkv)
        q, k, v = qkv[..., :H], qkv[..., H:2 * H], qkv[..., 2 * H:]
    else:
        q = linear(q_in, wq, bq)
        w_kv = jnp.concatenate([p['wk'], p['wv']], axis=1)
        b_kv = jnp.concatenate([p['bk'], p['bv']], axis=0)
        kv = linear(kv_in, w_kv, b_kv)
        k, v = kv[..., :H], kv[..., H:]
    ctx = attention(q, k, v, add_mask, num_heads)
    return linear(ctx, p['wo'], p['bo'])


def ffn(x, p):
    h = linear(x, p['w1'], p['b1'], activation='gelu')   # bias + gelu fused into the epilogue
    return linear(h, p['w2'], p['b2'])


def self_attn_encoder_layer(x, add_mask, p, num_heads):
    # TODO(synk): exact TransformerEncoder definition not provided; standard BERT-style post-norm layer.
    a = mha(x, x, add_mask, p['attn'], num_heads)
    x = layer_norm(x + a, p['ln1_g'], p['ln1_b'])
    f = ffn(x, p['ffn'])
    return layer_norm(x + f, p['ln2_g'], p['ln2_b'])


def cross_modal_layer(q, kv, p, num_heads):
    # TODO(synk): exact CrossModalTransformerEncoder definition not provided; MulT-style pre-norm block.
    qn = layer_norm(q, p['lnq_g'], p['lnq_b'])
    kn = layer_norm(kv, p['lnk_g'], p['lnk_b'])
    q = q + mha(qn, kn, None, p['attn'], num_heads)      # no-mask path: mask input skipped entirely
    q = q + ffn(layer_norm(q, p['lnf_g'], p['lnf_b']), p['ffn'])
    return q


# ----------------------------------------------------------------------------
# Parameter initialization (deterministic, xavier-uniform like the reference _init_weights)
# ----------------------------------------------------------------------------

def init_params(key, *, hidden, text_embed_dim, vocab_size, vision_feature_dim,
                channels, vision_utt_max_len, num_labels,
                num_vision_layers, num_cm_layers, ffn_dim):
    k_iter = iter(jax.random.split(key, 256))

    def nk():
        return next(k_iter)

    def xavier(shape):
        fan_in, fan_out = shape[0], shape[-1]
        limit = float(np.sqrt(6.0 / (fan_in + fan_out)))
        return jax.random.uniform(nk(), shape, jnp.float32, -limit, limit)

    def lin(i, o):
        return {'w': xavier((i, o)), 'b': jnp.zeros((o,), jnp.float32)}

    def mha_params(h):
        return {'wq': xavier((h, h)), 'bq': jnp.zeros((h,), jnp.float32),
                'wk': xavier((h, h)), 'bk': jnp.zeros((h,), jnp.float32),
                'wv': xavier((h, h)), 'bv': jnp.zeros((h,), jnp.float32),
                'wo': xavier((h, h)), 'bo': jnp.zeros((h,), jnp.float32)}

    def ffn_params(h, f):
        return {'w1': xavier((h, f)), 'b1': jnp.zeros((f,), jnp.float32),
                'w2': xavier((f, h)), 'b2': jnp.zeros((h,), jnp.float32)}

    def self_layer(h, f):
        return {'attn': mha_params(h), 'ffn': ffn_params(h, f),
                'ln1_g': jnp.ones((h,), jnp.float32), 'ln1_b': jnp.zeros((h,), jnp.float32),
                'ln2_g': jnp.ones((h,), jnp.float32), 'ln2_b': jnp.zeros((h,), jnp.float32)}

    def cm_layer(h, f):
        return {'attn': mha_params(h), 'ffn': ffn_params(h, f),
                'lnq_g': jnp.ones((h,), jnp.float32), 'lnq_b': jnp.zeros((h,), jnp.float32),
                'lnk_g': jnp.ones((h,), jnp.float32), 'lnk_b': jnp.zeros((h,), jnp.float32),
                'lnf_g': jnp.ones((h,), jnp.float32), 'lnf_b': jnp.zeros((h,), jnp.float32)}

    return {
        # TODO(synk): pretrained HuggingFace context_encoder replaced by a deterministic
        # embedding-table stand-in (no checkpoint loading in this synthetic kernel).
        'text_embed': 0.02 * jax.random.normal(nk(), (vocab_size, text_embed_dim), jnp.float32),
        'text_linear': lin(text_embed_dim, hidden),
        # TODO(synk): external set_vision_encoder CNN replaced by avg-pool + Pallas linear stand-in.
        'vision_encoder': lin(channels, vision_feature_dim),
        'vision_linear': lin(vision_feature_dim, hidden),
        'vision_pos': 0.02 * jax.random.normal(nk(), (vision_utt_max_len, hidden), jnp.float32),
        'vision_utt_transformer': [self_layer(hidden, ffn_dim) for _ in range(num_vision_layers)],
        'cm_tv_transformer': [cm_layer(hidden, ffn_dim) for _ in range(num_cm_layers)],
        'additive_attn': {'w': xavier((hidden, hidden)),
                          'b': jnp.zeros((hidden,), jnp.float32),
                          'v': xavier((hidden, 1))},
        'classifier': lin(hidden, num_labels),
    }


# ----------------------------------------------------------------------------
# Full forward pass (mirrors VLEModel.forward)
# ----------------------------------------------------------------------------

def vle_forward(params, text_input_ids, vision_inputs, vision_mask, cfg):
    B, T = text_input_ids.shape
    _, V, C, Hh, Ww = vision_inputs.shape
    nh = cfg['num_heads']
    pad_value = cfg['pad_value']

    # text_mask = 1 - (ids == pad)
    text_mask = (text_input_ids != pad_value).astype(jnp.float32)            # (B, T)

    # ---- gen_text_reps: context encoder stand-in + text_linear (Pallas) ----
    tok_emb = params['text_embed'][text_input_ids]                           # (B, T, E) gather glue
    text_utt = linear(tok_emb, params['text_linear']['w'], params['text_linear']['b'])  # (B,T,H)

    # ---- gen_vision_reps: vision encoder stand-in + vision_linear (Pallas) ----
    imgs = vision_inputs.reshape(B * V, C, Hh * Ww)
    pooled = jnp.mean(imgs, axis=-1)                                         # (B*V, C)
    vis_emb = linear(pooled, params['vision_encoder']['w'], params['vision_encoder']['b'])
    # emulate `output_embeddings[vision_mask > 0] = embeddings` (masked-out rows stay zero)
    vis_emb = vis_emb * (vision_mask.reshape(B * V, 1) > 0).astype(jnp.float32)
    vis_emb = vis_emb.reshape(B, V, -1)
    vision_lin = linear(vis_emb, params['vision_linear']['w'], params['vision_linear']['b'])  # (B,V,H)

    # ---- vision self-attn transformer (additive mask like the reference) ----
    vmask_f = vision_mask.astype(jnp.float32)
    vis_add_mask = ((1.0 - vmask_f) * ATTN_MASK_FILL).reshape(B, 1, V)
    x = vision_lin + params['vision_pos'][None, :V, :]
    for lp in params['vision_utt_transformer']:
        x = self_attn_encoder_layer(x, vis_add_mask, lp, nh)
    vision_utt = x                                                           # (B, V, H)

    # ---- cross-modal transformer (same module / shared weights for both directions) ----
    tv = text_utt
    for lp in params['cm_tv_transformer']:
        tv = cross_modal_layer(tv, vision_utt, lp, nh)                       # (B, T, H)
    vt = vision_utt
    for lp in params['cm_tv_transformer']:
        vt = cross_modal_layer(vt, text_utt, lp, nh)                         # (B, V, H)

    # concat over the sequence axis (== torch concat on dim 0 of seq-first tensors)
    cross_feat = jnp.concatenate([tv, vt], axis=1)                           # (B, T+V, H)
    tv_mask = jnp.concatenate([text_mask, vmask_f], axis=1)                  # (B, T+V)

    # ---- fused additive-attention projection + pooling (single Pallas kernel) ----
    pa = params['additive_attn']
    multimodal_out = additive_attn_pool(cross_feat, pa['w'], pa['b'], pa['v'], tv_mask)  # (B, H)

    # dropout is identity at inference
    logits = linear(multimodal_out, params['classifier']['w'], params['classifier']['b'])
    return logits                                                            # (B, num_labels)


# ----------------------------------------------------------------------------

if __name__ == "__main__":
    B, T, V = 2, 8, 8          # batch, text seq len, vision utterance max len
    C, S = 4, 16               # image channels / spatial size (NCHW)
    vocab, E, Dv = 50, 32, 32  # vocab size, text embed dim, vision feature dim
    H, nh, ffn_dim = 32, 4, 64
    num_labels = 4
    PAD = 0

    key = jax.random.PRNGKey(0)
    k1, k2, kp = jax.random.split(key, 3)

    text_input_ids = jax.random.randint(k1, (B, T), 1, vocab).astype(jnp.int32)
    text_input_ids = text_input_ids.at[0, -2:].set(PAD)                      # some padding
    vision_inputs = jax.random.normal(k2, (B, V, C, S, S), jnp.float32)
    vision_mask = jnp.ones((B, V), jnp.int32).at[1, -3:].set(0)              # some missing frames

    params = init_params(kp, hidden=H, text_embed_dim=E, vocab_size=vocab,
                         vision_feature_dim=Dv, channels=C, vision_utt_max_len=V,
                         num_labels=num_labels, num_vision_layers=1, num_cm_layers=1,
                         ffn_dim=ffn_dim)

    cfg = dict(hidden_size=H, num_heads=nh, pad_value=PAD)

    fwd = jax.jit(lambda p, t, vi, vm: vle_forward(p, t, vi, vm, cfg))
    logits = fwd(params, text_input_ids, vision_inputs, vision_mask)
    logits = jax.block_until_ready(logits)

    assert logits.shape == (B, num_labels), logits.shape
    assert bool(jnp.all(jnp.isfinite(logits)))
    print("KERNEL_OK")
</pallas_src>

<mosaic_0001>
module attributes {stable_mosaic.version = 11 : i64} {
  func.func @_linear_kernel(%arg0: i32, %arg1: i32, %arg2: i32, %arg3: memref<16x128xbf16, #tpu.memory_space<vmem>>, %arg4: memref<128x128xbf16, #tpu.memory_space<vmem>>, %arg5: memref<1x128xf32, #tpu.memory_space<vmem>>, %arg6: memref<16x128xf32, #tpu.memory_space<vmem>>, %arg7: memref<16x128xf32, #tpu.memory_space<vmem>>) attributes {dimension_semantics = [#tpu.dimension_semantics<parallel>, #tpu.dimension_semantics<parallel>, #tpu.dimension_semantics<arbitrary>], iteration_bounds = array<i64: 1, 1, 1>, scalar_prefetch = 0 : i64, scratch_operands = 1 : i64, tpu.core_type = #tpu.core_type<tc>, window_params = [{transform_indices = @transform_0, window_bounds = array<i64: 16, 128>}, {transform_indices = @transform_1, window_bounds = array<i64: 128, 128>}, {transform_indices = @transform_2, window_bounds = array<i64: 1, 128>}, {transform_indices = @transform_3, window_bounds = array<i64: 16, 128>}]} {
    %c0_i32 = arith.constant 0 : i32
    %0 = arith.cmpi eq, %arg2, %c0_i32 : i32
    %1 = arith.extui %0 : i1 to i32
    %c0_i32_0 = arith.constant 0 : i32
    %2 = arith.cmpi ne, %1, %c0_i32_0 : i32
    scf.if %2 {
      %cst_10 = arith.constant 0.000000e+00 : f32
      %12 = vector.broadcast %cst_10 : f32 to vector<16x128xf32>
      %c0_11 = arith.constant 0 : index
      %c0_12 = arith.constant 0 : index
      %13 = vector.load %arg7[%c0_11, %c0_12] : memref<16x128xf32, #tpu.memory_space<vmem>>, vector<16x128xf32>
      tpu.vector_store %arg7[%c0_11, %c0_12], %12 {strides = array<i32>} : memref<16x128xf32, #tpu.memory_space<vmem>>, vector<16x128xf32>,
    } else {
    }
    %c0 = arith.constant 0 : index
    %c0_1 = arith.constant 0 : index
    %3 = vector.load %arg7[%c0, %c0_1] : memref<16x128xf32, #tpu.memory_space<vmem>>, vector<16x128xf32>
    %c0_2 = arith.constant 0 : index
    %c0_3 = arith.constant 0 : index
    %4 = vector.load %arg3[%c0_2, %c0_3] : memref<16x128xbf16, #tpu.memory_space<vmem>>, vector<16x128xbf16>
    %c0_4 = arith.constant 0 : index
    %c0_5 = arith.constant 0 : index
    %5 = vector.load %arg4[%c0_4, %c0_5] : memref<128x128xbf16, #tpu.memory_space<vmem>>, vector<128x128xbf16>
    %cst = arith.constant dense<0.000000e+00> : vector<16x128xf32>
    %6 = tpu.matmul %4, %5, %cst {dimension_numbers = #tpu.dot_dimension_numbers<[1], [0], [0], [1], [0, 0, 1, 1], [], []>} : vector<16x128xbf16>, vector<128x128xbf16>, vector<16x128xf32> -> vector<16x128xf32>
    %7 = arith.addf %3, %6 : vector<16x128xf32>
    %c0_6 = arith.constant 0 : index
    %c0_7 = arith.constant 0 : index
    %8 = vector.load %arg7[%c0_6, %c0_7] : memref<16x128xf32, #tpu.memory_space<vmem>>, vector<16x128xf32>
    tpu.vector_store %arg7[%c0_6, %c0_7], %7 {strides = array<i32>} : memref<16x128xf32, #tpu.memory_space<vmem>>, vector<16x128xf32>,
    %c0_i32_8 = arith.constant 0 : i32
    %9 = arith.cmpi eq, %arg2, %c0_i32_8 : i32
    %10 = arith.extui %9 : i1 to i32
    %c0_i32_9 = arith.constant 0 : i32
    %11 = arith.cmpi ne, %10, %c0_i32_9 : i32
    scf.if %11 {
      %c0_10 = arith.constant 0 : index
      %c0_11 = arith.constant 0 : index
      %12 = vector.load %arg7[%c0_10, %c0_11] : memref<16x128xf32, #tpu.memory_space<vmem>>, vector<16x128xf32>
      %c0_12 = arith.constant 0 : index
      %c0_13 = arith.constant 0 : index
      %13 = vector.load %arg5[%c0_12, %c0_13] : memref<1x128xf32, #tpu.memory_space<vmem>>, vector<1x128xf32>
      %14 = vector.broadcast %13 : vector<1x128xf32> to vector<16x128xf32>
      %15 = arith.addf %12, %14 : vector<16x128xf32>
      %c0_14 = arith.constant 0 : index
      %c0_15 = arith.constant 0 : index
      %16 = vector.load %arg6[%c0_14, %c0_15] : memref<16x128xf32, #tpu.memory_space<vmem>>, vector<16x128xf32>
      tpu.vector_store %arg6[%c0_14, %c0_15], %15 {strides = array<i32>} : memref<16x128xf32, #tpu.memory_space<vmem>>, vector<16x128xf32>,
    } else {
    }
    return
  }
  func.func @transform_0(%arg0: i32, %arg1: i32, %arg2: i32) -> (i32, i32) {
    %c0_i32 = arith.constant 0 : i32
    return %arg0, %arg2 : i32, i32
  }
  func.func @transform_1(%arg0: i32, %arg1: i32, %arg2: i32) -> (i32, i32) {
    %c0_i32 = arith.constant 0 : i32
    return %arg2, %arg1 : i32, i32
  }
  func.func @transform_2(%arg0: i32, %arg1: i32, %arg2: i32) -> (i32, i32) {
    %c0_i32 = arith.constant 0 : i32
    %c0_i32_0 = arith.constant 0 : i32
    return %c0_i32, %arg1 : i32, i32
  }
  func.func @transform_3(%arg0: i32, %arg1: i32, %arg2: i32) -> (i32, i32) {
    %c0_i32 = arith.constant 0 : i32
    return %arg0, %arg1 : i32, i32
  }
}

module attributes {stable_mosaic.version = 11 : i64} {
  func.func @_attn_kernel(%arg0: i32, %arg1: memref<1x4x8x128xbf16, #tpu.memory_space<vmem>>, %arg2: memref<1x4x8x128xbf16, #tpu.memory_space<vmem>>, %arg3: memref<1x4x8x128xbf16, #tpu.memory_space<vmem>>, %arg4: memref<1x1x8xf32, #tpu.memory_space<vmem>>, %arg5: memref<1x4x8x128xf32, #tpu.memory_space<vmem>>) attributes {dimension_semantics = [#tpu.dimension_semantics<parallel>], iteration_bounds = array<i64: 2>, scalar_prefetch = 0 : i64, scratch_operands = 0 : i64, tpu.core_type = #tpu.core_type<tc>, window_params = [{transform_indices = @transform_0, window_bounds = array<i64: 1, 4, 8, 128>}, {transform_indices = @transform_1, window_bounds = array<i64: 1, 4, 8, 128>}, {transform_indices = @transform_2, window_bounds = array<i64: 1, 4, 8, 128>}, {transform_indices = @transform_3, window_bounds = array<i64: 1, 1, 8>}, {transform_indices = @transform_4, window_bounds = array<i64: 1, 4, 8, 128>}]} {
    %c0 = arith.constant 0 : index
    %c0_0 = arith.constant 0 : index
    %c0_1 = arith.constant 0 : index
    %c0_2 = arith.constant 0 : index
    %0 = vector.load %arg1[%c0, %c0_0, %c0_1, %c0_2] : memref<1x4x8x128xbf16, #tpu.memory_space<vmem>>, vector<1x4x8x128xbf16>
    %1 = vector.shape_cast %0 : vector<1x4x8x128xbf16> to vector<4x8x128xbf16>
    %c0_3 = arith.constant 0 : index
    %c0_4 = arith.constant 0 : index
    %c0_5 = arith.constant 0 : index
    %c0_6 = arith.constant 0 : index
    %2 = vector.load %arg2[%c0_3, %c0_4, %c0_5, %c0_6] : memref<1x4x8x128xbf16, #tpu.memory_space<vmem>>, vector<1x4x8x128xbf16>
    %3 = vector.shape_cast %2 : vector<1x4x8x128xbf16> to vector<4x8x128xbf16>
    %c0_7 = arith.constant 0 : index
    %c0_8 = arith.constant 0 : index
    %c0_9 = arith.constant 0 : index
    %c0_10 = arith.constant 0 : index
    %4 = vector.load %arg3[%c0_7, %c0_8, %c0_9, %c0_10] : memref<1x4x8x128xbf16, #tpu.memory_space<vmem>>, vector<1x4x8x128xbf16>
    %5 = vector.shape_cast %4 : vector<1x4x8x128xbf16> to vector<4x8x128xbf16>
    "tpu.trace_start"() <{level = 10 : i32, message = "hqd,hkd->hqk"}> : () -> ()
    %cst = arith.constant dense<0.000000e+00> : vector<4x8x8xf32>
    %6 = tpu.matmul %1, %3, %cst {dimension_numbers = #tpu.dot_dimension_numbers<[2], [2], [1], [1], [0, 0, 0, 1, 1, 1], [0], [0]>} : vector<4x8x128xbf16>, vector<4x8x128xbf16>, vector<4x8x8xf32> -> vector<4x8x8xf32>
    "tpu.trace_stop"() : () -> ()
    %c0_11 = arith.constant 0 : index
    %c0_12 = arith.constant 0 : index
    %c0_13 = arith.constant 0 : index
    %7 = vector.load %arg4[%c0_11, %c0_12, %c0_13] : memref<1x1x8xf32, #tpu.memory_space<vmem>>, vector<1x1x8xf32>
    %8 = vector.broadcast %7 : vector<1x1x8xf32> to vector<4x8x8xf32>
    %9 = arith.addf %6, %8 : vector<4x8x8xf32>
    %cst_14 = arith.constant dense<0xFF800000> : vector<4x8xf32>
    %10 = vector.multi_reduction <maximumf>, %9, %cst_14 [2] : vector<4x8x8xf32> to vector<4x8xf32>
    %11 = vector.shape_cast %10 : vector<4x8xf32> to vector<4x8x1xf32>
    %12 = vector.broadcast %11 : vector<4x8x1xf32> to vector<4x8x8xf32>
    %13 = arith.subf %9, %12 : vector<4x8x8xf32>
    %14 = math.exp %13 : vector<4x8x8xf32>
    %cst_15 = arith.constant dense<0.000000e+00> : vector<4x8xf32>
    %15 = vector.multi_reduction <add>, %14, %cst_15 [2] : vector<4x8x8xf32> to vector<4x8xf32>
    %16 = vector.shape_cast %15 : vector<4x8xf32> to vector<4x8x1xf32>
    %17 = tpu.reciprocal %16 {approx = true} : vector<4x8x1xf32> -> vector<4x8x1xf32>
    %18 = vector.broadcast %17 : vector<4x8x1xf32> to vector<4x8x8xf32>
    %19 = arith.mulf %14, %18 : vector<4x8x8xf32>
    %20 = arith.truncf %19 : vector<4x8x8xf32> to vector<4x8x8xbf16>
    "tpu.trace_start"() <{level = 10 : i32, message = "hqk,hkd->hqd"}> : () -> ()
    %cst_16 = arith.constant dense<0.000000e+00> : vector<4x8x128xf32>
    %21 = tpu.matmul %20, %5, %cst_16 {dimension_numbers = #tpu.dot_dimension_numbers<[2], [1], [1], [2], [0, 0, 0, 1, 1, 2], [0], [0]>} : vector<4x8x8xbf16>, vector<4x8x128xbf16>, vector<4x8x128xf32> -> vector<4x8x128xf32>
    "tpu.trace_stop"() : () -> ()
    %c0_17 = arith.constant 0 : index
    %c0_18 = arith.constant 0 : index
    %c0_19 = arith.constant 0 : index
    %c0_20 = arith.constant 0 : index
    %22 = vector.load %arg5[%c0_17, %c0_18, %c0_19, %c0_20] : memref<1x4x8x128xf32, #tpu.memory_space<vmem>>, vector<1x4x8x128xf32>
    %23 = vector.shape_cast %22 : vector<1x4x8x128xf32> to vector<4x8x128xf32>
    %24 = vector.shape_cast %21 : vector<4x8x128xf32> to vector<1x4x8x128xf32>
    tpu.vector_store %arg5[%c0_17, %c0_18, %c0_19, %c0_20], %24 {strides = array<i32>} : memref<1x4x8x128xf32, #tpu.memory_space<vmem>>, vector<1x4x8x128xf32>,
    return
  }
  func.func @transform_0(%arg0: i32) -> (i32, i32, i32, i32) {
    %c0_i32 = arith.constant 0 : i32
    %c0_i32_0 = arith.constant 0 : i32
    %c0_i32_1 = arith.constant 0 : i32
    %c0_i32_2 = arith.constant 0 : i32
    return %arg0, %c0_i32, %c0_i32_0, %c0_i32_1 : i32, i32, i32, i32
  }
  func.func @transform_1(%arg0: i32) -> (i32, i32, i32, i32) {
    %c0_i32 = arith.constant 0 : i32
    %c0_i32_0 = arith.constant 0 : i32
    %c0_i32_1 = arith.constant 0 : i32
    %c0_i32_2 = arith.constant 0 : i32
    return %arg0, %c0_i32, %c0_i32_0, %c0_i32_1 : i32, i32, i32, i32
  }
  func.func @transform_2(%arg0: i32) -> (i32, i32, i32, i32) {
    %c0_i32 = arith.constant 0 : i32
    %c0_i32_0 = arith.constant 0 : i32
    %c0_i32_1 = arith.constant 0 : i32
    %c0_i32_2 = arith.constant 0 : i32
    return %arg0, %c0_i32, %c0_i32_0, %c0_i32_1 : i32, i32, i32, i32
  }
  func.func @transform_3(%arg0: i32) -> (i32, i32, i32) {
    %c0_i32 = arith.constant 0 : i32
    %c0_i32_0 = arith.constant 0 : i32
    %c0_i32_1 = arith.constant 0 : i32
    return %arg0, %c0_i32, %c0_i32_0 : i32, i32, i32
  }
  func.func @transform_4(%arg0: i32) -> (i32, i32, i32, i32) {
    %c0_i32 = arith.constant 0 : i32
    %c0_i32_0 = arith.constant 0 : i32
    %c0_i32_1 = arith.constant 0 : i32
    %c0_i32_2 = arith.constant 0 : i32
    return %arg0, %c0_i32, %c0_i32_0, %c0_i32_1 : i32, i32, i32, i32
  }
}

module attributes {stable_mosaic.version = 11 : i64} {
  func.func @_linear_kernel(%arg0: i32, %arg1: i32, %arg2: i32, %arg3: memref<16x128xbf16, #tpu.memory_space<vmem>>, %arg4: memref<128x128xbf16, #tpu.memory_space<vmem>>, %arg5: memref<1x128xf32, #tpu.memory_space<vmem>>, %arg6: memref<16x128xf32, #tpu.memory_space<vmem>>, %arg7: memref<16x128xf32, #tpu.memory_space<vmem>>) attributes {dimension_semantics = [#tpu.dimension_semantics<parallel>, #tpu.dimension_semantics<parallel>, #tpu.dimension_semantics<arbitrary>], iteration_bounds = array<i64: 1, 1, 1>, scalar_prefetch = 0 : i64, scratch_operands = 1 : i64, tpu.core_type = #tpu.core_type<tc>, window_params = [{transform_indices = @transform_0, window_bounds = array<i64: 16, 128>}, {transform_indices = @transform_1, window_bounds = array<i64: 128, 128>}, {transform_indices = @transform_2, window_bounds = array<i64: 1, 128>}, {transform_indices = @transform_3, window_bounds = array<i64: 16, 128>}]} {
    %c0_i32 = arith.constant 0 : i32
    %0 = arith.cmpi eq, %arg2, %c0_i32 : i32
    %1 = arith.extui %0 : i1 to i32
    %c0_i32_0 = arith.constant 0 : i32
    %2 = arith.cmpi ne, %1, %c0_i32_0 : i32
    scf.if %2 {
      %cst_10 = arith.constant 0.000000e+00 : f32
      %12 = vector.broadcast %cst_10 : f32 to vector<16x128xf32>
      %c0_11 = arith.constant 0 : index
      %c0_12 = arith.constant 0 : index
      %13 = vector.load %arg7[%c0_11, %c0_12] : memref<16x128xf32, #tpu.memory_space<vmem>>, vector<16x128xf32>
      tpu.vector_store %arg7[%c0_11, %c0_12], %12 {strides = array<i32>} : memref<16x128xf32, #tpu.memory_space<vmem>>, vector<16x128xf32>,
    } else {
    }
    %c0 = arith.constant 0 : index
    %c0_1 = arith.constant 0 : index
    %3 = vector.load %arg7[%c0, %c0_1] : memref<16x128xf32, #tpu.memory_space<vmem>>, vector<16x128xf32>
    %c0_2 = arith.constant 0 : index
    %c0_3 = arith.constant 0 : index
    %4 = vector.load %arg3[%c0_2, %c0_3] : memref<16x128xbf16, #tpu.memory_space<vmem>>, vector<16x128xbf16>
    %c0_4 = arith.constant 0 : index
    %c0_5 = arith.constant 0 : index
    %5 = vector.load %arg4[%c0_4, %c0_5] : memref<128x128xbf16, #tpu.memory_space<vmem>>, vector<128x128xbf16>
    %cst = arith.constant dense<0.000000e+00> : vector<16x128xf32>
    %6 = tpu.matmul %4, %5, %cst {dimension_numbers = #tpu.dot_dimension_numbers<[1], [0], [0], [1], [0, 0, 1, 1], [], []>} : vector<16x128xbf16>, vector<128x128xbf16>, vector<16x128xf32> -> vector<16x128xf32>
    %7 = arith.addf %3, %6 : vector<16x128xf32>
    %c0_6 = arith.constant 0 : index
    %c0_7 = arith.constant 0 : index
    %8 = vector.load %arg7[%c0_6, %c0_7] : memref<16x128xf32, #tpu.memory_space<vmem>>, vector<16x128xf32>
    tpu.vector_store %arg7[%c0_6, %c0_7], %7 {strides = array<i32>} : memref<16x128xf32, #tpu.memory_space<vmem>>, vector<16x128xf32>,
    %c0_i32_8 = arith.constant 0 : i32
    %9 = arith.cmpi eq, %arg2, %c0_i32_8 : i32
    %10 = arith.extui %9 : i1 to i32
    %c0_i32_9 = arith.constant 0 : i32
    %11 = arith.cmpi ne, %10, %c0_i32_9 : i32
    scf.if %11 {
      %c0_10 = arith.constant 0 : index
      %c0_11 = arith.constant 0 : index
      %12 = vector.load %arg7[%c0_10, %c0_11] : memref<16x128xf32, #tpu.memory_space<vmem>>, vector<16x128xf32>
      %c0_12 = arith.constant 0 : index
      %c0_13 = arith.constant 0 : index
      %13 = vector.load %arg5[%c0_12, %c0_13] : memref<1x128xf32, #tpu.memory_space<vmem>>, vector<1x128xf32>
      %14 = vector.broadcast %13 : vector<1x128xf32> to vector<16x128xf32>
      %15 = arith.addf %12, %14 : vector<16x128xf32>
      %16 = arith.mulf %15, %15 : vector<16x128xf32>
      %17 = arith.mulf %15, %16 : vector<16x128xf32>
      %cst_14 = arith.constant 4.471500e-02 : f32
      %18 = vector.broadcast %cst_14 : f32 to vector<16x128xf32>
      %19 = arith.mulf %18, %17 : vector<16x128xf32>
      %20 = arith.addf %15, %19 : vector<16x128xf32>
      %cst_15 = arith.constant 0.797884583 : f32
      %21 = vector.broadcast %cst_15 : f32 to vector<16x128xf32>
      %22 = arith.mulf %21, %20 : vector<16x128xf32>
      %23 = math.tanh %22 : vector<16x128xf32>
      %cst_16 = arith.constant 1.000000e+00 : f32
      %24 = vector.broadcast %cst_16 : f32 to vector<16x128xf32>
      %25 = arith.addf %24, %23 : vector<16x128xf32>
      %cst_17 = arith.constant 5.000000e-01 : f32
      %26 = vector.broadcast %cst_17 : f32 to vector<16x128xf32>
      %27 = arith.mulf %26, %25 : vector<16x128xf32>
      %28 = arith.mulf %15, %27 : vector<16x128xf32>
      %c0_18 = arith.constant 0 : index
      %c0_19 = arith.constant 0 : index
      %29 = vector.load %arg6[%c0_18, %c0_19] : memref<16x128xf32, #tpu.memory_space<vmem>>, vector<16x128xf32>
      tpu.vector_store %arg6[%c0_18, %c0_19], %28 {strides = array<i32>} : memref<16x128xf32, #tpu.memory_space<vmem>>, vector<16x128xf32>,
    } else {
    }
    return
  }
  func.func @transform_0(%arg0: i32, %arg1: i32, %arg2: i32) -> (i32, i32) {
    %c0_i32 = arith.constant 0 : i32
    return %arg0, %arg2 : i32, i32
  }
  func.func @transform_1(%arg0: i32, %arg1: i32, %arg2: i32) -> (i32, i32) {
    %c0_i32 = arith.constant 0 : i32
    return %arg2, %arg1 : i32, i32
  }
  func.func @transform_2(%arg0: i32, %arg1: i32, %arg2: i32) -> (i32, i32) {
    %c0_i32 = arith.constant 0 : i32
    %c0_i32_0 = arith.constant 0 : i32
    return %c0_i32, %arg1 : i32, i32
  }
  func.func @transform_3(%arg0: i32, %arg1: i32, %arg2: i32) -> (i32, i32) {
    %c0_i32 = arith.constant 0 : i32
    return %arg0, %arg1 : i32, i32
  }
}

module attributes {stable_mosaic.version = 11 : i64} {
  func.func @_attn_kernel(%arg0: i32, %arg1: memref<1x4x8x128xbf16, #tpu.memory_space<vmem>>, %arg2: memref<1x4x8x128xbf16, #tpu.memory_space<vmem>>, %arg3: memref<1x4x8x128xbf16, #tpu.memory_space<vmem>>, %arg4: memref<1x4x8x128xf32, #tpu.memory_space<vmem>>) attributes {dimension_semantics = [#tpu.dimension_semantics<parallel>], iteration_bounds = array<i64: 2>, scalar_prefetch = 0 : i64, scratch_operands = 0 : i64, tpu.core_type = #tpu.core_type<tc>, window_params = [{transform_indices = @transform_0, window_bounds = array<i64: 1, 4, 8, 128>}, {transform_indices = @transform_1, window_bounds = array<i64: 1, 4, 8, 128>}, {transform_indices = @transform_2, window_bounds = array<i64: 1, 4, 8, 128>}, {transform_indices = @transform_3, window_bounds = array<i64: 1, 4, 8, 128>}]} {
    %c0 = arith.constant 0 : index
    %c0_0 = arith.constant 0 : index
    %c0_1 = arith.constant 0 : index
    %c0_2 = arith.constant 0 : index
    %0 = vector.load %arg1[%c0, %c0_0, %c0_1, %c0_2] : memref<1x4x8x128xbf16, #tpu.memory_space<vmem>>, vector<1x4x8x128xbf16>
    %1 = vector.shape_cast %0 : vector<1x4x8x128xbf16> to vector<4x8x128xbf16>
    %c0_3 = arith.constant 0 : index
    %c0_4 = arith.constant 0 : index
    %c0_5 = arith.constant 0 : index
    %c0_6 = arith.constant 0 : index
    %2 = vector.load %arg2[%c0_3, %c0_4, %c0_5, %c0_6] : memref<1x4x8x128xbf16, #tpu.memory_space<vmem>>, vector<1x4x8x128xbf16>
    %3 = vector.shape_cast %2 : vector<1x4x8x128xbf16> to vector<4x8x128xbf16>
    %c0_7 = arith.constant 0 : index
    %c0_8 = arith.constant 0 : index
    %c0_9 = arith.constant 0 : index
    %c0_10 = arith.constant 0 : index
    %4 = vector.load %arg3[%c0_7, %c0_8, %c0_9, %c0_10] : memref<1x4x8x128xbf16, #tpu.memory_space<vmem>>, vector<1x4x8x128xbf16>
    %5 = vector.shape_cast %4 : vector<1x4x8x128xbf16> to vector<4x8x128xbf16>
    "tpu.trace_start"() <{level = 10 : i32, message = "hqd,hkd->hqk"}> : () -> ()
    %cst = arith.constant dense<0.000000e+00> : vector<4x8x8xf32>
    %6 = tpu.matmul %1, %3, %cst {dimension_numbers = #tpu.dot_dimension_numbers<[2], [2], [1], [1], [0, 0, 0, 1, 1, 1], [0], [0]>} : vector<4x8x128xbf16>, vector<4x8x128xbf16>, vector<4x8x8xf32> -> vector<4x8x8xf32>
    "tpu.trace_stop"() : () -> ()
    %cst_11 = arith.constant dense<0xFF800000> : vector<4x8xf32>
    %7 = vector.multi_reduction <maximumf>, %6, %cst_11 [2] : vector<4x8x8xf32> to vector<4x8xf32>
    %8 = vector.shape_cast %7 : vector<4x8xf32> to vector<4x8x1xf32>
    %9 = vector.broadcast %8 : vector<4x8x1xf32> to vector<4x8x8xf32>
    %10 = arith.subf %6, %9 : vector<4x8x8xf32>
    %11 = math.exp %10 : vector<4x8x8xf32>
    %cst_12 = arith.constant dense<0.000000e+00> : vector<4x8xf32>
    %12 = vector.multi_reduction <add>, %11, %cst_12 [2] : vector<4x8x8xf32> to vector<4x8xf32>
    %13 = vector.shape_cast %12 : vector<4x8xf32> to vector<4x8x1xf32>
    %14 = tpu.reciprocal %13 {approx = true} : vector<4x8x1xf32> -> vector<4x8x1xf32>
    %15 = vector.broadcast %14 : vector<4x8x1xf32> to vector<4x8x8xf32>
    %16 = arith.mulf %11, %15 : vector<4x8x8xf32>
    %17 = arith.truncf %16 : vector<4x8x8xf32> to vector<4x8x8xbf16>
    "tpu.trace_start"() <{level = 10 : i32, message = "hqk,hkd->hqd"}> : () -> ()
    %cst_13 = arith.constant dense<0.000000e+00> : vector<4x8x128xf32>
    %18 = tpu.matmul %17, %5, %cst_13 {dimension_numbers = #tpu.dot_dimension_numbers<[2], [1], [1], [2], [0, 0, 0, 1, 1, 2], [0], [0]>} : vector<4x8x8xbf16>, vector<4x8x128xbf16>, vector<4x8x128xf32> -> vector<4x8x128xf32>
    "tpu.trace_stop"() : () -> ()
    %c0_14 = arith.constant 0 : index
    %c0_15 = arith.constant 0 : index
    %c0_16 = arith.constant 0 : index
    %c0_17 = arith.constant 0 : index
    %19 = vector.load %arg4[%c0_14, %c0_15, %c0_16, %c0_17] : memref<1x4x8x128xf32, #tpu.memory_space<vmem>>, vector<1x4x8x128xf32>
    %20 = vector.shape_cast %19 : vector<1x4x8x128xf32> to vector<4x8x128xf32>
    %21 = vector.shape_cast %18 : vector<4x8x128xf32> to vector<1x4x8x128xf32>
    tpu.vector_store %arg4[%c0_14, %c0_15, %c0_16, %c0_17], %21 {strides = array<i32>} : memref<1x4x8x128xf32, #tpu.memory_space<vmem>>, vector<1x4x8x128xf32>,
    return
  }
  func.func @transform_0(%arg0: i32) -> (i32, i32, i32, i32) {
    %c0_i32 = arith.constant 0 : i32
    %c0_i32_0 = arith.constant 0 : i32
    %c0_i32_1 = arith.constant 0 : i32
    %c0_i32_2 = arith.constant 0 : i32
    return %arg0, %c0_i32, %c0_i32_0, %c0_i32_1 : i32, i32, i32, i32
  }
  func.func @transform_1(%arg0: i32) -> (i32, i32, i32, i32) {
    %c0_i32 = arith.constant 0 : i32
    %c0_i32_0 = arith.constant 0 : i32
    %c0_i32_1 = arith.constant 0 : i32
    %c0_i32_2 = arith.constant 0 : i32
    return %arg0, %c0_i32, %c0_i32_0, %c0_i32_1 : i32, i32, i32, i32
  }
  func.func @transform_2(%arg0: i32) -> (i32, i32, i32, i32) {
    %c0_i32 = arith.constant 0 : i32
    %c0_i32_0 = arith.constant 0 : i32
    %c0_i32_1 = arith.constant 0 : i32
    %c0_i32_2 = arith.constant 0 : i32
    return %arg0, %c0_i32, %c0_i32_0, %c0_i32_1 : i32, i32, i32, i32
  }
  func.func @transform_3(%arg0: i32) -> (i32, i32, i32, i32) {
    %c0_i32 = arith.constant 0 : i32
    %c0_i32_0 = arith.constant 0 : i32
    %c0_i32_1 = arith.constant 0 : i32
    %c0_i32_2 = arith.constant 0 : i32
    return %arg0, %c0_i32, %c0_i32_0, %c0_i32_1 : i32, i32, i32, i32
  }
}

module attributes {stable_mosaic.version = 11 : i64} {
  func.func @_addattn_pool_kernel(%arg0: i32, %arg1: memref<1x16x128xbf16, #tpu.memory_space<vmem>>, %arg2: memref<128x128xbf16, #tpu.memory_space<vmem>>, %arg3: memref<1x128xf32, #tpu.memory_space<vmem>>, %arg4: memref<1x128xf32, #tpu.memory_space<vmem>>, %arg5: memref<1x16x1xf32, #tpu.memory_space<vmem>>, %arg6: memref<1x1x128xf32, #tpu.memory_space<vmem>>) attributes {dimension_semantics = [#tpu.dimension_semantics<parallel>], iteration_bounds = array<i64: 2>, scalar_prefetch = 0 : i64, scratch_operands = 0 : i64, tpu.core_type = #tpu.core_type<tc>, window_params = [{transform_indices = @transform_0, window_bounds = array<i64: 1, 16, 128>}, {pipeline_mode = #tpu.pipeline_mode<synchronous>, transform_indices = @transform_1, window_bounds = array<i64: 128, 128>}, {pipeline_mode = #tpu.pipeline_mode<synchronous>, transform_indices = @transform_2, window_bounds = array<i64: 1, 128>}, {pipeline_mode = #tpu.pipeline_mode<synchronous>, transform_indices = @transform_3, window_bounds = array<i64: 1, 128>}, {transform_indices = @transform_4, window_bounds = array<i64: 1, 16, 1>}, {transform_indices = @transform_5, window_bounds = array<i64: 1, 1, 128>}]} {
    %c0 = arith.constant 0 : index
    %c0_0 = arith.constant 0 : index
    %c0_1 = arith.constant 0 : index
    %0 = vector.load %arg1[%c0, %c0_0, %c0_1] : memref<1x16x128xbf16, #tpu.memory_space<vmem>>, vector<1x16x128xbf16>
    %1 = vector.shape_cast %0 : vector<1x16x128xbf16> to vector<16x128xbf16>
    %c0_2 = arith.constant 0 : index
    %c0_3 = arith.constant 0 : index
    %2 = vector.load %arg2[%c0_2, %c0_3] : memref<128x128xbf16, #tpu.memory_space<vmem>>, vector<128x128xbf16>
    %cst = arith.constant dense<0.000000e+00> : vector<16x128xf32>
    %3 = tpu.matmul %1, %2, %cst {dimension_numbers = #tpu.dot_dimension_numbers<[1], [0], [0], [1], [0, 0, 1, 1], [], []>} : vector<16x128xbf16>, vector<128x128xbf16>, vector<16x128xf32> -> vector<16x128xf32>
    %c0_4 = arith.constant 0 : index
    %c0_5 = arith.constant 0 : index
    %4 = vector.load %arg3[%c0_4, %c0_5] : memref<1x128xf32, #tpu.memory_space<vmem>>, vector<1x128xf32>
    %5 = vector.broadcast %4 : vector<1x128xf32> to vector<16x128xf32>
    %6 = arith.addf %3, %5 : vector<16x128xf32>
    %7 = math.tanh %6 : vector<16x128xf32>
    %c0_6 = arith.constant 0 : index
    %c0_7 = arith.constant 0 : index
    %8 = vector.load %arg4[%c0_6, %c0_7] : memref<1x128xf32, #tpu.memory_space<vmem>>, vector<1x128xf32>
    %9 = vector.broadcast %8 : vector<1x128xf32> to vector<16x128xf32>
    %10 = arith.mulf %7, %9 : vector<16x128xf32>
    %cst_8 = arith.constant dense<0.000000e+00> : vector<16xf32>
    %11 = vector.multi_reduction <add>, %10, %cst_8 [1] : vector<16x128xf32> to vector<16xf32>
    %12 = vector.shape_cast %11 : vector<16xf32> to vector<16x1xf32>
    %c0_9 = arith.constant 0 : index
    %c0_10 = arith.constant 0 : index
    %c0_11 = arith.constant 0 : index
    %13 = vector.load %arg5[%c0_9, %c0_10, %c0_11] : memref<1x16x1xf32, #tpu.memory_space<vmem>>, vector<1x16x1xf32>
    %14 = vector.shape_cast %13 : vector<1x16x1xf32> to vector<16x1xf32>
    %cst_12 = arith.constant 0.000000e+00 : f32
    %15 = vector.broadcast %cst_12 : f32 to vector<16x1xf32>
    %16 = arith.cmpf ogt, %14, %15 : vector<16x1xf32>
    %cst_13 = arith.constant -1.000000e+04 : f32
    %17 = vector.broadcast %cst_13 : f32 to vector<16x1xf32>
    %18 = arith.select %16, %12, %17 : vector<16x1xi1>, vector<16x1xf32>
    %cst_14 = arith.constant dense<0xFF800000> : vector<1xf32>
    %19 = vector.multi_reduction <maximumf>, %18, %cst_14 [0] : vector<16x1xf32> to vector<1xf32>
    %20 = vector.shape_cast %19 : vector<1xf32> to vector<1x1xf32>
    %21 = vector.broadcast %20 : vector<1x1xf32> to vector<16x1xf32>
    %22 = arith.subf %18, %21 : vector<16x1xf32>
    %23 = math.exp %22 : vector<16x1xf32>
    %cst_15 = arith.constant dense<0.000000e+00> : vector<1xf32>
    %24 = vector.multi_reduction <add>, %23, %cst_15 [0] : vector<16x1xf32> to vector<1xf32>
    %25 = vector.shape_cast %24 : vector<1xf32> to vector<1x1xf32>
    %26 = tpu.reciprocal %25 {approx = true} : vector<1x1xf32> -> vector<1x1xf32>
    %27 = vector.broadcast %26 : vector<1x1xf32> to vector<16x1xf32>
    %28 = arith.mulf %23, %27 : vector<16x1xf32>
    %29 = arith.extf %1 : vector<16x128xbf16> to vector<16x128xf32>
    %30 = vector.broadcast %28 : vector<16x1xf32> to vector<16x128xf32>
    %31 = arith.mulf %30, %29 : vector<16x128xf32>
    %cst_16 = arith.constant dense<0.000000e+00> : vector<128xf32>
    %32 = vector.multi_reduction <add>, %31, %cst_16 [0] : vector<16x128xf32> to vector<128xf32>
    %33 = vector.shape_cast %32 : vector<128xf32> to vector<1x128xf32>
    %c0_17 = arith.constant 0 : index
    %c0_18 = arith.constant 0 : index
    %c0_19 = arith.constant 0 : index
    %34 = vector.load %arg6[%c0_17, %c0_18, %c0_19] : memref<1x1x128xf32, #tpu.memory_space<vmem>>, vector<1x1x128xf32>
    %35 = vector.shape_cast %34 : vector<1x1x128xf32> to vector<1x128xf32>
    %36 = vector.shape_cast %33 : vector<1x128xf32> to vector<1x1x128xf32>
    tpu.vector_store %arg6[%c0_17, %c0_18, %c0_19], %36 {strides = array<i32>} : memref<1x1x128xf32, #tpu.memory_space<vmem>>, vector<1x1x128xf32>,
    return
  }
  func.func @transform_0(%arg0: i32) -> (i32, i32, i32) {
    %c0_i32 = arith.constant 0 : i32
    %c0_i32_0 = arith.constant 0 : i32
    %c0_i32_1 = arith.constant 0 : i32
    return %arg0, %c0_i32, %c0_i32_0 : i32, i32, i32
  }
  func.func @transform_1(%arg0: i32) -> (i32, i32) {
    %c0_i32 = arith.constant 0 : i32
    %c0_i32_0 = arith.constant 0 : i32
    %c0_i32_1 = arith.constant 0 : i32
    return %c0_i32, %c0_i32_0 : i32, i32
  }
  func.func @transform_2(%arg0: i32) -> (i32, i32) {
    %c0_i32 = arith.constant 0 : i32
    %c0_i32_0 = arith.constant 0 : i32
    %c0_i32_1 = arith.constant 0 : i32
    return %c0_i32, %c0_i32_0 : i32, i32
  }
  func.func @transform_3(%arg0: i32) -> (i32, i32) {
    %c0_i32 = arith.constant 0 : i32
    %c0_i32_0 = arith.constant 0 : i32
    %c0_i32_1 = arith.constant 0 : i32
    return %c0_i32, %c0_i32_0 : i32, i32
  }
  func.func @transform_4(%arg0: i32) -> (i32, i32, i32) {
    %c0_i32 = arith.constant 0 : i32
    %c0_i32_0 = arith.constant 0 : i32
    %c0_i32_1 = arith.constant 0 : i32
    return %arg0, %c0_i32, %c0_i32_0 : i32, i32, i32
  }
  func.func @transform_5(%arg0: i32) -> (i32, i32, i32) {
    %c0_i32 = arith.constant 0 : i32
    %c0_i32_0 = arith.constant 0 : i32
    %c0_i32_1 = arith.constant 0 : i32
    return %arg0, %c0_i32, %c0_i32_0 : i32, i32, i32
  }
}

module attributes {stable_mosaic.version = 11 : i64} {
  func.func @_linear_kernel(%arg0: i32, %arg1: i32, %arg2: i32, %arg3: memref<8x128xbf16, #tpu.memory_space<vmem>>, %arg4: memref<128x128xbf16, #tpu.memory_space<vmem>>, %arg5: memref<1x128xf32, #tpu.memory_space<vmem>>, %arg6: memref<8x128xf32, #tpu.memory_space<vmem>>, %arg7: memref<8x128xf32, #tpu.memory_space<vmem>>) attributes {dimension_semantics = [#tpu.dimension_semantics<parallel>, #tpu.dimension_semantics<parallel>, #tpu.dimension_semantics<arbitrary>], iteration_bounds = array<i64: 1, 1, 1>, scalar_prefetch = 0 : i64, scratch_operands = 1 : i64, tpu.core_type = #tpu.core_type<tc>, window_params = [{transform_indices = @transform_0, window_bounds = array<i64: 8, 128>}, {transform_indices = @transform_1, window_bounds = array<i64: 128, 128>}, {transform_indices = @transform_2, window_bounds = array<i64: 1, 128>}, {transform_indices = @transform_3, window_bounds = array<i64: 8, 128>}]} {
    %c0_i32 = arith.constant 0 : i32
    %0 = arith.cmpi eq, %arg2, %c0_i32 : i32
    %1 = arith.extui %0 : i1 to i32
    %c0_i32_0 = arith.constant 0 : i32
    %2 = arith.cmpi ne, %1, %c0_i32_0 : i32
    scf.if %2 {
      %cst_10 = arith.constant 0.000000e+00 : f32
      %12 = vector.broadcast %cst_10 : f32 to vector<8x128xf32>
      %c0_11 = arith.constant 0 : index
      %c0_12 = arith.constant 0 : index
      %13 = vector.load %arg7[%c0_11, %c0_12] : memref<8x128xf32, #tpu.memory_space<vmem>>, vector<8x128xf32>
      tpu.vector_store %arg7[%c0_11, %c0_12], %12 {strides = array<i32>} : memref<8x128xf32, #tpu.memory_space<vmem>>, vector<8x128xf32>,
    } else {
    }
    %c0 = arith.constant 0 : index
    %c0_1 = arith.constant 0 : index
    %3 = vector.load %arg7[%c0, %c0_1] : memref<8x128xf32, #tpu.memory_space<vmem>>, vector<8x128xf32>
    %c0_2 = arith.constant 0 : index
    %c0_3 = arith.constant 0 : index
    %4 = vector.load %arg3[%c0_2, %c0_3] : memref<8x128xbf16, #tpu.memory_space<vmem>>, vector<8x128xbf16>
    %c0_4 = arith.constant 0 : index
    %c0_5 = arith.constant 0 : index
    %5 = vector.load %arg4[%c0_4, %c0_5] : memref<128x128xbf16, #tpu.memory_space<vmem>>, vector<128x128xbf16>
    %cst = arith.constant dense<0.000000e+00> : vector<8x128xf32>
    %6 = tpu.matmul %4, %5, %cst {dimension_numbers = #tpu.dot_dimension_numbers<[1], [0], [0], [1], [0, 0, 1, 1], [], []>} : vector<8x128xbf16>, vector<128x128xbf16>, vector<8x128xf32> -> vector<8x128xf32>
    %7 = arith.addf %3, %6 : vector<8x128xf32>
    %c0_6 = arith.constant 0 : index
    %c0_7 = arith.constant 0 : index
    %8 = vector.load %arg7[%c0_6, %c0_7] : memref<8x128xf32, #tpu.memory_space<vmem>>, vector<8x128xf32>
    tpu.vector_store %arg7[%c0_6, %c0_7], %7 {strides = array<i32>} : memref<8x128xf32, #tpu.memory_space<vmem>>, vector<8x128xf32>,
    %c0_i32_8 = arith.constant 0 : i32
    %9 = arith.cmpi eq, %arg2, %c0_i32_8 : i32
    %10 = arith.extui %9 : i1 to i32
    %c0_i32_9 = arith.constant 0 : i32
    %11 = arith.cmpi ne, %10, %c0_i32_9 : i32
    scf.if %11 {
      %c0_10 = arith.constant 0 : index
      %c0_11 = arith.constant 0 : index
      %12 = vector.load %arg7[%c0_10, %c0_11] : memref<8x128xf32, #tpu.memory_space<vmem>>, vector<8x128xf32>
      %c0_12 = arith.constant 0 : index
      %c0_13 = arith.constant 0 : index
      %13 = vector.load %arg5[%c0_12, %c0_13] : memref<1x128xf32, #tpu.memory_space<vmem>>, vector<1x128xf32>
      %14 = vector.broadcast %13 : vector<1x128xf32> to vector<8x128xf32>
      %15 = arith.addf %12, %14 : vector<8x128xf32>
      %c0_14 = arith.constant 0 : index
      %c0_15 = arith.constant 0 : index
      %16 = vector.load %arg6[%c0_14, %c0_15] : memref<8x128xf32, #tpu.memory_space<vmem>>, vector<8x128xf32>
      tpu.vector_store %arg6[%c0_14, %c0_15], %15 {strides = array<i32>} : memref<8x128xf32, #tpu.memory_space<vmem>>, vector<8x128xf32>,
    } else {
    }
    return
  }
  func.func @transform_0(%arg0: i32, %arg1: i32, %arg2: i32) -> (i32, i32) {
    %c0_i32 = arith.constant 0 : i32
    return %arg0, %arg2 : i32, i32
  }
  func.func @transform_1(%arg0: i32, %arg1: i32, %arg2: i32) -> (i32, i32) {
    %c0_i32 = arith.constant 0 : i32
    return %arg2, %arg1 : i32, i32
  }
  func.func @transform_2(%arg0: i32, %arg1: i32, %arg2: i32) -> (i32, i32) {
    %c0_i32 = arith.constant 0 : i32
    %c0_i32_0 = arith.constant 0 : i32
    return %c0_i32, %arg1 : i32, i32
  }
  func.func @transform_3(%arg0: i32, %arg1: i32, %arg2: i32) -> (i32, i32) {
    %c0_i32 = arith.constant 0 : i32
    return %arg0, %arg1 : i32, i32
  }
}

</mosaic_0001>

<bundles_post_ra>
// kernel: _lambda_.23
= control target key start
LH: loop header
LB: loop body
LE: loop exit
PB: predicated region body
PF: predicated region fallthrough
CT: control target
= control target key end

     0   :  { %s231_s1 = inlined_call_operand.vmem [shape: bf16[128,128], index: 1, kind: input, shape index: {}]   ;;  %s232_s2 = inlined_call_operand.vmem [shape: f32[1,128], index: 2, kind: input, shape index: {}]   ;;  %s233_s0 = inlined_call_operand.vmem [shape: bf16[16,128], index: 0, kind: input, shape index: {}]   ;;  %s234_s3 = inlined_call_operand.vmem [shape: f32[16,128], index: 3, kind: output, shape index: {}]  }
   0x1   :  { %v173_v0 = vld [vmem:[%s231_s1 + $0x38] sm:$0xff]  ;;  %v172_v1 = vld [vmem:[%s231_s1 + $0x30] sm:$0xff]  ;;  %v171_v2 = vld [vmem:[%s231_s1 + $0x28] sm:$0xff] }
   0x2   :  { %94 = vmatpush.bf16.msra.mxu0 %v173_v0  ;;  %v170_v3 = vld [vmem:[%s231_s1 + $0x20] sm:$0xff]  ;;  %v169_v4 = vld [vmem:[%s231_s1 + $0x18] sm:$0xff]  ;;  %v168_v5 = vld [vmem:[%s231_s1 + $0x10] sm:$0xff] }
   0x3   :  { %v167_v6 = vld [vmem:[%s231_s1 + $0x8] sm:$0xff]  ;;  %v166_v7 = vld [vmem:[%s231_s1] sm:$0xff] }
   0x4   :  { %v165_v8 = vld [vmem:[%s233_s0] sm:$0xff] }
   0x5   :  { %v174_v9 = vld [vmem:[%s232_s2] ss:$0 sm:$0xff] }
   0x6   :  { %95 = vmatpush.bf16.msra.mxu0 %v172_v1 }
   0xa   :  { %96 = vmatpush.bf16.msra.mxu0 %v171_v2 }
   0xe   :  { %97 = vmatpush.bf16.msra.mxu0 %v170_v3 }
  0x12   :  { %98 = vmatpush.bf16.msra.mxu0 %v169_v4 }
  0x16   :  { %99 = vmatpush.bf16.msra.mxu0 %v168_v5 }
  0x1a   :  { %100 = vmatpush.bf16.msra.mxu0 %v167_v6 }
  0x1e   :  { %101 = vmatpush.bf16.msra.mxu0 %v166_v7 }
  0x21   :  { %102 = vmatmul.bf16.vlgmr.msra.gmra.mxu0 %v165_v8 }
  0x9e   :  { %v103_v10 = vpop.f32.mrf.mxu0 }
  0x9f   :  { %v121_v11 = vadd.f32 %v174_v9, %v103_v10 }
  0xa1   :  { %123 = vst [vmem:[%s234_s3] sm:$0xff] %v121_v11 }
  0xa6   :  { %v105_v12 = vpop.f32.mrf.mxu0 }
  0xa7   :  { %v122_v13 = vadd.f32 %v174_v9, %v105_v12 }
  0xa9   :  { %124 = vst [vmem:[%s234_s3 + $0x8] sm:$0xff] %v122_v13 }

// kernel: _lambda_.26
= control target key start
LH: loop header
LB: loop body
LE: loop exit
PB: predicated region body
PF: predicated region fallthrough
CT: control target
= control target key end

     0   :  { %s620_s15 = smov 0   ;;  %s668_s0 = inlined_call_operand.vmem [shape: bf16[2,4,8,128], index: 0, kind: input, shape index: {}]   ;;  %s669_s1 = inlined_call_operand.vmem [shape: bf16[2,4,8,128], index: 1, kind: input, shape index: {}]   ;;  %s670_s2 = inlined_call_operand.vmem [shape: bf16[2,4,8,128], index: 2, kind: input, shape index: {}]   ;;  %s671_s3 = inlined_call_operand.vmem [shape: f32[2,1,8], index: 3, kind: input, shape index: {}]   ;;  %s672_s4 = inlined_call_operand.vmem [shape: f32[2,4,8,128], index: 4, kind: output, shape index: {}]  }
   0x1 LB: > { %s539_s16 = sadd.s32 4294967295, %s593_s15   ;;  %p543_p0 = scmp.ge.s32.totalorder %s593_s15, 1  ;;  %s593_s15 = sphi %s620_s15, %s14_s15  }
   0x2   : > { %p190_p1 = scmp.lt.s32.totalorder %s593_s15, 3 }
   0x4   : > { %p191_p2 = pnand %p543_p0, %p190_p1 }
   0x5   : > { %p229_p3 = scmp.lt.s32.totalorder (!%p191_p2), %s539_s16, 1 }
   0x6   : > { %194 = sbr.rel (%p191_p2) target bundleno = 560 (0x230), region = 36 }
   0xb   : > { %s674_s16 = smov (!%p229_p3, %s539_s16), 1  ;;  %vm321_vm0 = vcmask 64512   ;;  %vm373_vm1 = vcmask 1043456  }
   0xc   : > { %s631_s17 = sshll.u32 %s674_s16, 4  ;;  %s246_s20 = scalar_lea.vmem %s671_s3, %s674_s16 }
   0xd   : > { %s238_s23 = scalar_lea.vmem %s669_s1, %s631_s17  ;;  %s233_s26 = scalar_lea.vmem %s668_s0, %s631_s17  ;;  %v570_v8 = vld [vmem:[%s246_s20] ss:$0 sm:$0xff] }
   0xe   : > { %v257_v0 = vld [vmem:[%s238_s23] sm:$0xf]  ;;  %v259_v1 = vld [vmem:[%s238_s23 + $0x8] sm:$0xf]  ;;  %v260_v2 = vld [vmem:[%s238_s23 + $0xc] sm:$0xf]  ;;  %s243_s29 = scalar_lea.vmem %s670_s2, %s631_s17 }
   0xf   : > { %276 = vmatpush.bf16.xpose.msra.mxu0 %v257_v0  ;;  %302 = vmatpush.bf16.xpose.msra.mxu2 %v259_v1  ;;  %v258_v3 = vld [vmem:[%s238_s23 + $0x4] sm:$0xf]  ;;  %v253_v4 = vld [vmem:[%s233_s26] sm:$0xf]  ;;  %v255_v5 = vld [vmem:[%s233_s26 + $0x8] sm:$0xf] }
  0x10   : > { %315 = vmatpush.bf16.xpose.msra.mxu3 %v260_v2  ;;  %289 = vmatpush.bf16.xpose.msra.mxu1 %v258_v3  ;;  %v256_v6 = vld [vmem:[%s233_s26 + $0xc] sm:$0xf]  ;;  %v254_v7 = vld [vmem:[%s233_s26 + $0x4] sm:$0xf]  ;;  %v261_v45 = vld [vmem:[%s243_s29] sm:$0xf] }
  0x11   : > { %v375_v46 = vsel %vm373_vm1, %v261_v45, 0  ;;  %v263_v47 = vld [vmem:[%s243_s29 + $0x8] sm:$0xf]  ;;  %v262_v49 = vld [vmem:[%s243_s29 + $0x4] sm:$0xf]  ;;  %s561_s30 = sshll.u32 %s674_s16, 5 }
  0x12   : > { %v413_v48 = vsel %vm373_vm1, %v263_v47, 0  ;;  %v394_v50 = vsel %vm373_vm1, %v262_v49, 0  ;;  %v264_v51 = vld [vmem:[%s243_s29 + $0xc] sm:$0xf]  ;;  %s251_s7 = scalar_lea.vmem %s672_s4, %s561_s30 }
  0x13   : > { %v432_v52 = vsel %vm373_vm1, %v264_v51, 0 }
  0x16   : > { %277 = vmatmul.bf16.vlgmr.msra.gmra.mxu0 %v253_v4  ;;  %303 = vmatmul.bf16.vlgmr.msra.gmra.mxu2 %v255_v5 }
  0x17   : > { %316 = vmatmul.bf16.vlgmr.msra.gmra.mxu3 %v256_v6  ;;  %290 = vmatmul.bf16.vlgmr.msra.gmra.mxu1 %v254_v7 }
  0x18   : > { %384 = vmatpush.bf16.msrb.mxu0 %v375_v46  ;;  %422 = vmatpush.bf16.msrb.mxu2 %v413_v48 }
  0x19   : > { %403 = vmatpush.bf16.msrb.mxu1 %v394_v50  ;;  %441 = vmatpush.bf16.msrb.mxu3 %v432_v52 }
  0x93   : > { %v278_v9 = vpop.f32.mrf.mxu0 }
  0x94   : > { %v279_v10 = vadd.f32 %v570_v8, %v278_v9  ;;  %v291_v11 = vpop.f32.mrf.mxu1 }
  0x95   : > { %v292_v13 = vadd.f32 %v570_v8, %v291_v11 }
  0x96   : > { %v322_v12 = vsel %vm321_vm0, %v279_v10, -inf }
  0x97   : > { %323 = vmax.xlane.f32.xlu1 %v322_v12  ;;  %v325_v19 = vsel %vm321_vm0, %v292_v13, -inf }
  0x99   : > { %v304_v14 = vpop.f32.mrf.mxu2 }
  0x9a   : > { %v305_v15 = vadd.f32 %v570_v8, %v304_v14  ;;  %v317_v16 = vpop.f32.mrf.mxu3 }
  0x9b   : > { %v280_v17 = vpop.f32.mrf.mxu0  ;;  %v318_v21 = vadd.f32 %v570_v8, %v317_v16 }
  0x9c   : > { %v328_v18 = vsel %vm321_vm0, %v305_v15, -inf  ;;  %v293_v20 = vpop.f32.mrf.mxu1 }
  0x9d   : > { %329 = vmax.xlane.f32.xlu0 %v328_v18  ;;  %v331_v24 = vsel %vm321_vm0, %v318_v21, -inf }
  0x9f   : > { %326 = vmax.xlane.f32.xlu1 %v325_v19 }
  0xa1   : > { %v306_v22 = vpop.f32.mrf.mxu2 }
  0xa2   : > { %v319_v23 = vpop.f32.mrf.mxu3 }
  0xa5   : > { %332 = vmax.xlane.f32.xlu0 %v331_v24 }
 0x10a   : > { %v324_v25 = vpop.xlane.xlu1 %323 }
 0x10b   : > { %v334_v26 = vsub.f32 %v279_v10, %v324_v25 }
 0x10d   : > { %v338_v27 = vmul.f32 1.442695, %v334_v26 }
 0x10f   : > { %571 = vpow2.f32 %v338_v27 }
 0x110   : > { %v330_v28 = vpop.xlane.xlu0 %329 }
 0x111   : > { %v336_v29 = vsub.f32 %v305_v15, %v330_v28 }
 0x112   : > { %v327_v30 = vpop.xlane.xlu1 %326 }
 0x113   : > { %v342_v31 = vmul.f32 1.442695, %v336_v29  ;;  %v335_v32 = vsub.f32 %v292_v13, %v327_v30 }
 0x115   : > { %v572_v33 = vpop.eup %571  ;;  %573 = vpow2.f32 %v342_v31  ;;  %v340_v34 = vmul.f32 1.442695, %v335_v32 }
 0x116   : > { %v346_v35 = vsel %vm321_vm0, %v572_v33, 0.0 }
 0x117   : > { %575 = vpow2.f32 %v340_v34  ;;  %347 = vadd.xlane.f32.xlu0 %v346_v35 }
 0x118   : > { %v333_v36 = vpop.xlane.xlu0 %332 }
 0x119   : > { %v337_v37 = vsub.f32 %v318_v21, %v333_v36 }
 0x11b   : > { %v574_v38 = vpop.eup %573  ;;  %v344_v39 = vmul.f32 1.442695, %v337_v37 }
 0x11c   : > { %v352_v40 = vsel %vm321_vm0, %v574_v38, 0.0 }
 0x11d   : > { %v576_v41 = vpop.eup %575  ;;  %577 = vpow2.f32 %v344_v39  ;;  %353 = vadd.xlane.f32.xlu2 %v352_v40 }
 0x11e   : > { %v349_v42 = vsel %vm321_vm0, %v576_v41, 0.0 }
 0x11f   : > { %350 = vadd.xlane.f32.xlu1 %v349_v42 }
 0x123   : > { %v578_v43 = vpop.eup %577 }
 0x124   : > { %v355_v44 = vsel %vm321_vm0, %v578_v43, 0.0 }
 0x125   : > { %356 = vadd.xlane.f32.xlu2 %v355_v44 }
 0x18a   : > { %v348_v53 = vpop.xlane.xlu0 %347 }
 0x18b   : > { %579 = vrcp.f32 %v348_v53 }
 0x190   : > { %v354_v54 = vpop.xlane.xlu2 %353 }
 0x191   : > { %v580_v55 = vpop.eup %579  ;;  %581 = vrcp.f32 %v354_v54 }
 0x192   : > { %v362_v56 = vmul.f32 %v580_v55, %v572_v33  ;;  %v351_v57 = vpop.xlane.xlu1 %350 }
 0x193   : > { %583 = vrcp.f32 %v351_v57 }
 0x194   : > { %v366_v58 = vpack.c.bf16 %v362_v56, %v362_v56 }
 0x196   : > { %552 = vmatmul.msk.bf16.vlgmr.msrb.gmra.mxu0 %vm321_vm0, %v366_v58 }
 0x197   : > { %v582_v59 = vpop.eup %581 }
 0x198   : > { %v364_v60 = vmul.f32 %v582_v59, %v574_v38  ;;  %v357_v61 = vpop.xlane.xlu2 %356 }
 0x199   : > { %v584_v62 = vpop.eup %583  ;;  %585 = vrcp.f32 %v357_v61 }
 0x19a   : > { %v363_v63 = vmul.f32 %v584_v62, %v576_v41  ;;  %v368_v0 = vpack.c.bf16 %v364_v60, %v364_v60 }
 0x19c   : > { %v367_v1 = vpack.c.bf16 %v363_v63, %v363_v63  ;;  %554 = vmatmul.msk.bf16.vlgmr.msrb.gmra.mxu2 %vm321_vm0, %v368_v0 }
 0x19e   : > { %553 = vmatmul.msk.bf16.vlgmr.msrb.gmra.mxu1 %vm321_vm0, %v367_v1 }
 0x19f   : > { %v586_v2 = vpop.eup %585 }
 0x1a0   : > { %v365_v3 = vmul.f32 %v586_v2, %v578_v43 }
 0x1a2   : > { %v369_v4 = vpack.c.bf16 %v365_v3, %v365_v3 }
 0x1a4   : > { %555 = vmatmul.msk.bf16.vlgmr.msrb.gmra.mxu3 %vm321_vm0, %v369_v4 }
 0x213   : > { %v386_v5 = vpop.f32.mrf.mxu0 }
 0x214   : > { %447 = vst [vmem:[%s251_s7] sm:$0xff] %v386_v5 }
 0x21b   : > { %v388_v6 = vpop.f32.mrf.mxu0  ;;  %v405_v7 = vpop.f32.mrf.mxu1 }
 0x21c   : > { %448 = vst [vmem:[%s251_s7 + $0x8] sm:$0xff] %v405_v7 }
 0x21f   : > { %v424_v8 = vpop.f32.mrf.mxu2 }
 0x220   : > { %449 = vst [vmem:[%s251_s7 + $0x10] sm:$0xff] %v424_v8 }
 0x223   : > { %v407_v9 = vpop.f32.mrf.mxu1 }
 0x227   : > { %v426_v10 = vpop.f32.mrf.mxu2  ;;  %v443_v11 = vpop.f32.mrf.mxu3 }
 0x228   : > { %450 = vst [vmem:[%s251_s7 + $0x18] sm:$0xff] %v443_v11 }
 0x22f   : > { %v445_v12 = vpop.f32.mrf.mxu3 }
 0x230 PF: > { %s14_s15 = sadd.s32 1, %s593_s15  }
 0x231   : > { %p11_p4 = scmp.ge.s32.totalorder %s14_s15, 4  }
 0x233   :  { %13 = sbr.rel (!%p11_p4) target bundleno = 1 (0x1), region = 75 }

// kernel: _lambda_.28
= control target key start
LH: loop header
LB: loop body
LE: loop exit
PB: predicated region body
PF: predicated region fallthrough
CT: control target
= control target key end

     0   :  { %s253_s1 = inlined_call_operand.vmem [shape: bf16[128,128], index: 1, kind: input, shape index: {}]   ;;  %s254_s2 = inlined_call_operand.vmem [shape: f32[1,128], index: 2, kind: input, shape index: {}]   ;;  %s255_s0 = inlined_call_operand.vmem [shape: bf16[16,128], index: 0, kind: input, shape index: {}]   ;;  %s256_s3 = inlined_call_operand.vmem [shape: f32[16,128], index: 3, kind: output, shape index: {}]  }
   0x1   :  { %v191_v0 = vld [vmem:[%s253_s1 + $0x38] sm:$0xff]  ;;  %v190_v1 = vld [vmem:[%s253_s1 + $0x30] sm:$0xff]  ;;  %v189_v2 = vld [vmem:[%s253_s1 + $0x28] sm:$0xff] }
   0x2   :  { %94 = vmatpush.bf16.msra.mxu0 %v191_v0  ;;  %v188_v3 = vld [vmem:[%s253_s1 + $0x20] sm:$0xff]  ;;  %v187_v4 = vld [vmem:[%s253_s1 + $0x18] sm:$0xff]  ;;  %v186_v5 = vld [vmem:[%s253_s1 + $0x10] sm:$0xff] }
   0x3   :  { %v185_v6 = vld [vmem:[%s253_s1 + $0x8] sm:$0xff]  ;;  %v184_v7 = vld [vmem:[%s253_s1] sm:$0xff] }
   0x4   :  { %v183_v8 = vld [vmem:[%s255_s0] sm:$0xff] }
   0x5   :  { %v192_v9 = vld [vmem:[%s254_s2] ss:$0 sm:$0xff] }
   0x6   :  { %95 = vmatpush.bf16.msra.mxu0 %v190_v1 }
   0xa   :  { %96 = vmatpush.bf16.msra.mxu0 %v189_v2 }
   0xe   :  { %97 = vmatpush.bf16.msra.mxu0 %v188_v3 }
  0x12   :  { %98 = vmatpush.bf16.msra.mxu0 %v187_v4 }
  0x16   :  { %99 = vmatpush.bf16.msra.mxu0 %v186_v5 }
  0x1a   :  { %100 = vmatpush.bf16.msra.mxu0 %v185_v6 }
  0x1e   :  { %101 = vmatpush.bf16.msra.mxu0 %v184_v7 }
  0x21   :  { %102 = vmatmul.bf16.vlgmr.msra.gmra.mxu0 %v183_v8 }
  0x9e   :  { %v103_v10 = vpop.f32.mrf.mxu0 }
  0x9f   :  { %v121_v11 = vadd.f32 %v192_v9, %v103_v10 }
  0xa1   :  { %v123_v12 = vmul.f32 %v121_v11, %v121_v11 }
  0xa3   :  { %v125_v13 = vmul.f32 %v123_v12, %v121_v11 }
  0xa5   :  { %v127_v14 = vmul.f32 0.044715, %v125_v13 }
  0xa6   :  { %v105_v15 = vpop.f32.mrf.mxu0 }
  0xa7   :  { %v129_v16 = vadd.f32 %v127_v14, %v121_v11  ;;  %v122_v17 = vadd.f32 %v192_v9, %v105_v15 }
  0xa9   :  { %v131_v18 = vmul.f32 0.7978846, %v129_v16  ;;  %v124_v19 = vmul.f32 %v122_v17, %v122_v17 }
  0xab   :  { %193 = vtanh.f32 %v131_v18  ;;  %v126_v20 = vmul.f32 %v124_v19, %v122_v17 }
  0xad   :  { %v128_v21 = vmul.f32 0.044715, %v126_v20 }
  0xaf   :  { %v130_v22 = vadd.f32 %v128_v21, %v122_v17 }
  0xb1   :  { %v194_v23 = vpop.eup %193  ;;  %v132_v24 = vmul.f32 0.7978846, %v130_v22 }
  0xb2   :  { %v135_v25 = vadd.f32 1.0, %v194_v23 }
  0xb3   :  { %195 = vtanh.f32 %v132_v24 }
  0xb4   :  { %v137_v26 = vmul.f32 0.5, %v135_v25 }
  0xb6   :  { %v139_v27 = vmul.f32 %v137_v26, %v121_v11 }
  0xb8   :  { %141 = vst [vmem:[%s256_s3] sm:$0xff] %v139_v27 }
  0xb9   :  { %v196_v28 = vpop.eup %195 }
  0xba   :  { %v136_v29 = vadd.f32 1.0, %v196_v28 }
  0xbc   :  { %v138_v30 = vmul.f32 0.5, %v136_v29 }
  0xbe   :  { %v140_v31 = vmul.f32 %v138_v30, %v122_v17 }
  0xc0   :  { %142 = vst [vmem:[%s256_s3 + $0x8] sm:$0xff] %v140_v31 }

// kernel: _lambda_.38
= control target key start
LH: loop header
LB: loop body
LE: loop exit
PB: predicated region body
PF: predicated region fallthrough
CT: control target
= control target key end

     0   :  { %s560_s12 = smov 0   ;;  %s604_s0 = inlined_call_operand.vmem [shape: bf16[2,4,8,128], index: 0, kind: input, shape index: {}]   ;;  %s605_s1 = inlined_call_operand.vmem [shape: bf16[2,4,8,128], index: 1, kind: input, shape index: {}]   ;;  %s606_s2 = inlined_call_operand.vmem [shape: bf16[2,4,8,128], index: 2, kind: input, shape index: {}]   ;;  %s607_s3 = inlined_call_operand.vmem [shape: f32[2,4,8,128], index: 3, kind: output, shape index: {}]  }
   0x1 LB: > { %s485_s13 = sadd.s32 4294967295, %s538_s12   ;;  %p489_p0 = scmp.ge.s32.totalorder %s538_s12, 1  ;;  %s538_s12 = sphi %s560_s12, %s13_s12  }
   0x2   : > { %p157_p1 = scmp.lt.s32.totalorder %s538_s12, 3 }
   0x4   : > { %p158_p2 = pnand %p489_p0, %p157_p1 }
   0x5   : > { %p191_p3 = scmp.lt.s32.totalorder (!%p158_p2), %s485_s13, 1 }
   0x6   : > { %161 = sbr.rel (%p158_p2) target bundleno = 558 (0x22e), region = 32 }
   0xb   : > { %s609_s13 = smov (!%p191_p3, %s485_s13), 1  ;;  %vm276_vm0 = vcmask 64512   ;;  %vm328_vm1 = vcmask 1043456  }
   0xc   : > { %s571_s14 = sshll.u32 %s609_s13, 4  ;;  %s507_s24 = sshll.u32 %s609_s13, 5 }
   0xd   : > { %s200_s17 = scalar_lea.vmem %s605_s1, %s571_s14  ;;  %s195_s20 = scalar_lea.vmem %s604_s0, %s571_s14 }
   0xe   : > { %v216_v0 = vld [vmem:[%s200_s17] sm:$0xf]  ;;  %v218_v1 = vld [vmem:[%s200_s17 + $0x8] sm:$0xf]  ;;  %v219_v2 = vld [vmem:[%s200_s17 + $0xc] sm:$0xf]  ;;  %s205_s23 = scalar_lea.vmem %s606_s2, %s571_s14  ;;  %s210_s27 = scalar_lea.vmem %s607_s3, %s507_s24 }
   0xf   : > { %231 = vmatpush.bf16.xpose.msra.mxu0 %v216_v0  ;;  %257 = vmatpush.bf16.xpose.msra.mxu2 %v218_v1  ;;  %v217_v3 = vld [vmem:[%s200_s17 + $0x4] sm:$0xf]  ;;  %v212_v4 = vld [vmem:[%s195_s20] sm:$0xf]  ;;  %v214_v5 = vld [vmem:[%s195_s20 + $0x8] sm:$0xf] }
  0x10   : > { %270 = vmatpush.bf16.xpose.msra.mxu3 %v219_v2  ;;  %244 = vmatpush.bf16.xpose.msra.mxu1 %v217_v3  ;;  %v215_v6 = vld [vmem:[%s195_s20 + $0xc] sm:$0xf]  ;;  %v213_v7 = vld [vmem:[%s195_s20 + $0x4] sm:$0xf]  ;;  %v220_v40 = vld [vmem:[%s205_s23] sm:$0xf] }
  0x11   : > { %v330_v41 = vsel %vm328_vm1, %v220_v40, 0  ;;  %v222_v42 = vld [vmem:[%s205_s23 + $0x8] sm:$0xf]  ;;  %v221_v44 = vld [vmem:[%s205_s23 + $0x4] sm:$0xf] }
  0x12   : > { %v368_v43 = vsel %vm328_vm1, %v222_v42, 0  ;;  %v349_v45 = vsel %vm328_vm1, %v221_v44, 0  ;;  %v223_v46 = vld [vmem:[%s205_s23 + $0xc] sm:$0xf] }
  0x13   : > { %v387_v47 = vsel %vm328_vm1, %v223_v46, 0 }
  0x16   : > { %232 = vmatmul.bf16.vlgmr.msra.gmra.mxu0 %v212_v4  ;;  %258 = vmatmul.bf16.vlgmr.msra.gmra.mxu2 %v214_v5 }
  0x17   : > { %271 = vmatmul.bf16.vlgmr.msra.gmra.mxu3 %v215_v6  ;;  %245 = vmatmul.bf16.vlgmr.msra.gmra.mxu1 %v213_v7 }
  0x18   : > { %339 = vmatpush.bf16.msrb.mxu0 %v330_v41  ;;  %377 = vmatpush.bf16.msrb.mxu2 %v368_v43 }
  0x19   : > { %358 = vmatpush.bf16.msrb.mxu1 %v349_v45  ;;  %396 = vmatpush.bf16.msrb.mxu3 %v387_v47 }
  0x93   : > { %v233_v8 = vpop.f32.mrf.mxu0 }
  0x94   : > { %v277_v9 = vsel %vm276_vm0, %v233_v8, -inf  ;;  %v246_v10 = vpop.f32.mrf.mxu1 }
  0x95   : > { %278 = vmax.xlane.f32.xlu1 %v277_v9  ;;  %v280_v14 = vsel %vm276_vm0, %v246_v10, -inf }
  0x99   : > { %v259_v11 = vpop.f32.mrf.mxu2 }
  0x9a   : > { %v272_v12 = vpop.f32.mrf.mxu3  ;;  %v283_v13 = vsel %vm276_vm0, %v259_v11, -inf }
  0x9b   : > { %284 = vmax.xlane.f32.xlu0 %v283_v13  ;;  %v235_v15 = vpop.f32.mrf.mxu0  ;;  %v286_v17 = vsel %vm276_vm0, %v272_v12, -inf }
  0x9c   : > { %v248_v16 = vpop.f32.mrf.mxu1 }
  0x9d   : > { %281 = vmax.xlane.f32.xlu1 %v280_v14 }
  0xa1   : > { %v261_v18 = vpop.f32.mrf.mxu2 }
  0xa2   : > { %v274_v19 = vpop.f32.mrf.mxu3 }
  0xa3   : > { %287 = vmax.xlane.f32.xlu0 %v286_v17 }
 0x108   : > { %v279_v20 = vpop.xlane.xlu1 %278 }
 0x109   : > { %v289_v21 = vsub.f32 %v233_v8, %v279_v20 }
 0x10b   : > { %v293_v22 = vmul.f32 1.442695, %v289_v21 }
 0x10d   : > { %516 = vpow2.f32 %v293_v22 }
 0x10e   : > { %v285_v23 = vpop.xlane.xlu0 %284 }
 0x10f   : > { %v291_v24 = vsub.f32 %v259_v11, %v285_v23 }
 0x110   : > { %v282_v25 = vpop.xlane.xlu1 %281 }
 0x111   : > { %v297_v26 = vmul.f32 1.442695, %v291_v24  ;;  %v290_v27 = vsub.f32 %v246_v10, %v282_v25 }
 0x113   : > { %v517_v28 = vpop.eup %516  ;;  %518 = vpow2.f32 %v297_v26  ;;  %v295_v29 = vmul.f32 1.442695, %v290_v27 }
 0x114   : > { %v301_v30 = vsel %vm276_vm0, %v517_v28, 0.0 }
 0x115   : > { %520 = vpow2.f32 %v295_v29  ;;  %302 = vadd.xlane.f32.xlu0 %v301_v30 }
 0x116   : > { %v288_v31 = vpop.xlane.xlu0 %287 }
 0x117   : > { %v292_v32 = vsub.f32 %v272_v12, %v288_v31 }
 0x119   : > { %v519_v33 = vpop.eup %518  ;;  %v299_v34 = vmul.f32 1.442695, %v292_v32 }
 0x11a   : > { %v307_v35 = vsel %vm276_vm0, %v519_v33, 0.0 }
 0x11b   : > { %v521_v36 = vpop.eup %520  ;;  %522 = vpow2.f32 %v299_v34  ;;  %308 = vadd.xlane.f32.xlu2 %v307_v35 }
 0x11c   : > { %v304_v37 = vsel %vm276_vm0, %v521_v36, 0.0 }
 0x11d   : > { %305 = vadd.xlane.f32.xlu1 %v304_v37 }
 0x121   : > { %v523_v38 = vpop.eup %522 }
 0x122   : > { %v310_v39 = vsel %vm276_vm0, %v523_v38, 0.0 }
 0x123   : > { %311 = vadd.xlane.f32.xlu2 %v310_v39 }
 0x188   : > { %v303_v48 = vpop.xlane.xlu0 %302 }
 0x189   : > { %524 = vrcp.f32 %v303_v48 }
 0x18e   : > { %v309_v49 = vpop.xlane.xlu2 %308 }
 0x18f   : > { %v525_v50 = vpop.eup %524  ;;  %526 = vrcp.f32 %v309_v49 }
 0x190   : > { %v317_v51 = vmul.f32 %v525_v50, %v517_v28  ;;  %v306_v52 = vpop.xlane.xlu1 %305 }
 0x191   : > { %528 = vrcp.f32 %v306_v52 }
 0x192   : > { %v321_v53 = vpack.c.bf16 %v317_v51, %v317_v51 }
 0x194   : > { %498 = vmatmul.msk.bf16.vlgmr.msrb.gmra.mxu0 %vm276_vm0, %v321_v53 }
 0x195   : > { %v527_v54 = vpop.eup %526 }
 0x196   : > { %v319_v55 = vmul.f32 %v527_v54, %v519_v33  ;;  %v312_v56 = vpop.xlane.xlu2 %311 }
 0x197   : > { %v529_v57 = vpop.eup %528  ;;  %530 = vrcp.f32 %v312_v56 }
 0x198   : > { %v318_v58 = vmul.f32 %v529_v57, %v521_v36  ;;  %v323_v59 = vpack.c.bf16 %v319_v55, %v319_v55 }
 0x19a   : > { %v322_v60 = vpack.c.bf16 %v318_v58, %v318_v58  ;;  %500 = vmatmul.msk.bf16.vlgmr.msrb.gmra.mxu2 %vm276_vm0, %v323_v59 }
 0x19c   : > { %499 = vmatmul.msk.bf16.vlgmr.msrb.gmra.mxu1 %vm276_vm0, %v322_v60 }
 0x19d   : > { %v531_v61 = vpop.eup %530 }
 0x19e   : > { %v320_v62 = vmul.f32 %v531_v61, %v523_v38 }
 0x1a0   : > { %v324_v63 = vpack.c.bf16 %v320_v62, %v320_v62 }
 0x1a2   : > { %501 = vmatmul.msk.bf16.vlgmr.msrb.gmra.mxu3 %vm276_vm0, %v324_v63 }
 0x211   : > { %v341_v0 = vpop.f32.mrf.mxu0 }
 0x212   : > { %402 = vst [vmem:[%s210_s27] sm:$0xff] %v341_v0 }
 0x219   : > { %v343_v1 = vpop.f32.mrf.mxu0  ;;  %v360_v2 = vpop.f32.mrf.mxu1 }
 0x21a   : > { %403 = vst [vmem:[%s210_s27 + $0x8] sm:$0xff] %v360_v2 }
 0x21d   : > { %v379_v3 = vpop.f32.mrf.mxu2 }
 0x21e   : > { %404 = vst [vmem:[%s210_s27 + $0x10] sm:$0xff] %v379_v3 }
 0x221   : > { %v362_v4 = vpop.f32.mrf.mxu1 }
 0x225   : > { %v381_v5 = vpop.f32.mrf.mxu2  ;;  %v398_v6 = vpop.f32.mrf.mxu3 }
 0x226   : > { %405 = vst [vmem:[%s210_s27 + $0x18] sm:$0xff] %v398_v6 }
 0x22d   : > { %v400_v7 = vpop.f32.mrf.mxu3 }
 0x22e PF: > { %s13_s12 = sadd.s32 1, %s538_s12  }
 0x22f   : > { %p10_p4 = scmp.ge.s32.totalorder %s13_s12, 4  }
 0x231   :  { %12 = sbr.rel (!%p10_p4) target bundleno = 1 (0x1), region = 68 }

// kernel: _lambda_.42
= control target key start
LH: loop header
LB: loop body
LE: loop exit
PB: predicated region body
PF: predicated region fallthrough
CT: control target
= control target key end

     0   :  { %s578_s18 = smov 0   ;;  %s641_s0 = inlined_call_operand.vmem [shape: bf16[2,16,128], index: 0, kind: input, shape index: {}]   ;;  %s642_s1 = inlined_call_operand.vmem [shape: bf16[128,128], index: 1, kind: input, shape index: {}]   ;;  %s643_s2 = inlined_call_operand.vmem [shape: f32[1,128], index: 2, kind: input, shape index: {}]   ;;  %s644_s3 = inlined_call_operand.vmem [shape: f32[1,128], index: 3, kind: input, shape index: {}]   ;;  %s645_s4 = inlined_call_operand.vmem [shape: f32[2,16,1], index: 4, kind: input, shape index: {}]   ;;  %s646_s5 = inlined_call_operand.vmem [shape: f32[2,1,128], index: 5, kind: output, shape index: {}]  }
   0x1 LB: > { %s458_s19 = sadd.s32 4294967295, %s545_s18   ;;  %p462_p0 = scmp.ge.s32.totalorder %s545_s18, 1  ;;  %s545_s18 = sphi %s578_s18, %s15_s18  }
   0x2   : > { %p197_p1 = scmp.lt.s32.totalorder %s545_s18, 3 }
   0x4   : > { %p198_p2 = pnand %p462_p0, %p197_p1 }
   0x5   : > { %p228_p3 = scmp.lt.s32.totalorder (!%p198_p2), %s458_s19, 1 }
   0x6   : > { %201 = sbr.rel (%p198_p2) target bundleno = 496 (0x1f0), region = 40 }
   0xb   : > { %v515_v0 = vld [vmem:[%s642_s1 + $0x38] sm:$0xff]  ;;  %v514_v1 = vld [vmem:[%s642_s1 + $0x30] sm:$0xff]  ;;  %v513_v2 = vld [vmem:[%s642_s1 + $0x28] sm:$0xff]  ;;  %s648_s19 = smov (!%p228_p3, %s458_s19), 1  ;;  %vm349_vm2 = vcmask 7168   ;;  %v547_v28 = vmov 0  }
   0xc   : > { %317 = vmatpush.bf16.msra.mxu0 %v515_v0  ;;  %v512_v3 = vld [vmem:[%s642_s1 + $0x20] sm:$0xff]  ;;  %v511_v4 = vld [vmem:[%s642_s1 + $0x18] sm:$0xff]  ;;  %v510_v5 = vld [vmem:[%s642_s1 + $0x10] sm:$0xff]  ;;  %s505_s9 = sshll.u32 %s648_s19, 3  ;;  %s506_s21 = sshll.u32 %s648_s19, 4  ;;  %525 = vset.pattern.permute.xlu1 %v547_v28 }
   0xd   : > { %v509_v6 = vld [vmem:[%s642_s1 + $0x8] sm:$0xff]  ;;  %v508_v7 = vld [vmem:[%s642_s1] sm:$0xff]  ;;  %s616_s14 = scalar_lea.vmem %s641_s0, %s505_s9  ;;  %s237_s24 = scalar_lea.vmem %s645_s4, %s506_s21  ;;  %526 = vset.pattern.permute.xlu0 %v547_v28 }
   0xe   : > { %v507_v8 = vld [vmem:[%s616_s14] sm:$0xff]  ;;  %v344_v21 = vld [vmem:[%s237_s24 + $0x8] sm:$0xff]  ;;  %s240_s27 = scalar_lea.vmem %s646_s5, %s648_s19 }
   0xf   : > { %v527_v9 = vld [vmem:[%s643_s2] ss:$0 sm:$0xff]  ;;  %vm346_vm1 = vcmp.gt.f32.partialorder %v344_v21, 0.0 }
  0x10   : > { %318 = vmatpush.bf16.msra.mxu0 %v514_v1  ;;  %v528_v12 = vld [vmem:[%s644_s3] ss:$0 sm:$0xff] }
  0x11   : > { %v343_v20 = vld [vmem:[%s237_s24] sm:$0xff] }
  0x12   : > { %vm345_vm0 = vcmp.gt.f32.partialorder %v343_v20, 0.0  ;;  %v241_v54 = vld [vmem:[%s616_s14] sm:$0xff]  }
  0x13   : > { %v377_v55 = vunpack.c.l.bf16 %v241_v54  ;;  %v378_v56 = vunpack.c.h.bf16 %v241_v54 }
  0x14   : > { %319 = vmatpush.bf16.msra.mxu0 %v513_v2 }
  0x18   : > { %320 = vmatpush.bf16.msra.mxu0 %v512_v3 }
  0x1c   : > { %321 = vmatpush.bf16.msra.mxu0 %v511_v4 }
  0x20   : > { %322 = vmatpush.bf16.msra.mxu0 %v510_v5 }
  0x24   : > { %323 = vmatpush.bf16.msra.mxu0 %v509_v6 }
  0x28   : > { %324 = vmatpush.bf16.msra.mxu0 %v508_v7 }
  0x2b   : > { %325 = vmatmul.bf16.vlgmr.msra.gmra.mxu0 %v507_v8 }
  0xa8   : > { %v326_v10 = vpop.f32.mrf.mxu0 }
  0xa9   : > { %v327_v11 = vadd.f32 %v527_v9, %v326_v10 }
  0xab   : > { %529 = vtanh.f32 %v327_v11 }
  0xb0   : > { %v328_v13 = vpop.f32.mrf.mxu0 }
  0xb1   : > { %v530_v14 = vpop.eup %529  ;;  %v329_v15 = vadd.f32 %v527_v9, %v328_v13 }
  0xb2   : > { %v337_v16 = vmul.f32 %v530_v14, %v528_v12 }
  0xb3   : > { %531 = vtanh.f32 %v329_v15 }
  0xb4   : > { %339 = vadd.xlane.f32.xlu0 %v337_v16 }
  0xb9   : > { %v532_v17 = vpop.eup %531 }
  0xba   : > { %v338_v18 = vmul.f32 %v532_v17, %v528_v12 }
  0xbc   : > { %341 = vadd.xlane.f32.xlu0 %v338_v18 }
 0x127   : > { %v340_v19 = vpop.xlane.xlu0 %339 }
 0x128   : > { %v347_v22 = vsel %vm345_vm0, %v340_v19, -10000.0 }
 0x129   : > { %v350_v25 = vsel %vm349_vm2, %v347_v22, -inf }
 0x12f   : > { %v342_v23 = vpop.xlane.xlu0 %341 }
 0x130   : > { %v348_v24 = vsel %vm346_vm1, %v342_v23, -10000.0 }
 0x131   : > { %v351_v26 = vsel %vm349_vm2, %v348_v24, -inf }
 0x132   : > { %v352_v27 = vmax.f32 %v350_v25, %v351_v26 }
 0x134   : > { %v353_v29 = vrot.slane %v352_v27, 4 }
 0x136   : > { %v354_v30 = vmax.f32 %v352_v27, %v353_v29 }
 0x138   : > { %v355_v31 = vrot.slane %v354_v30, 2 }
 0x13a   : > { %v356_v32 = vmax.f32 %v354_v30, %v355_v31 }
 0x13c   : > { %v357_v33 = vrot.slane %v356_v32, 1 }
 0x13e   : > { %v358_v34 = vmax.f32 %v356_v32, %v357_v33 }
 0x140   : > { %v359_v35 = vsub.f32 %v347_v22, %v358_v34  ;;  %v360_v36 = vsub.f32 %v348_v24, %v358_v34 }
 0x142   : > { %v361_v37 = vmul.f32 1.442695, %v359_v35  ;;  %v363_v38 = vmul.f32 1.442695, %v360_v36 }
 0x144   : > { %533 = vpow2.f32 %v361_v37 }
 0x145   : > { %535 = vpow2.f32 %v363_v38 }
 0x14a   : > { %v534_v39 = vpop.eup %533 }
 0x14b   : > { %v536_v40 = vpop.eup %535  ;;  %v365_v41 = vsel %vm349_vm2, %v534_v39, 0.0 }
 0x14c   : > { %v366_v42 = vsel %vm349_vm2, %v536_v40, 0.0 }
 0x14d   : > { %v367_v43 = vadd.f32 %v366_v42, %v365_v41 }
 0x14f   : > { %v368_v44 = vrot.slane %v367_v43, 4 }
 0x151   : > { %v369_v45 = vadd.f32 %v368_v44, %v367_v43 }
 0x153   : > { %v370_v46 = vrot.slane %v369_v45, 2 }
 0x155   : > { %v371_v47 = vadd.f32 %v370_v46, %v369_v45 }
 0x157   : > { %v372_v48 = vrot.slane %v371_v47, 1 }
 0x159   : > { %v373_v49 = vadd.f32 %v372_v48, %v371_v47 }
 0x15b   : > { %537 = vrcp.f32 %v373_v49 }
 0x161   : > { %v538_v50 = vpop.eup %537 }
 0x162   : > { %v375_v51 = vmul.f32 %v538_v50, %v534_v39  ;;  %v376_v52 = vmul.f32 %v538_v50, %v536_v40 }
 0x164   : > { %381 = vperm.xlu1 %525, %v375_v51  }
 0x16c   : > { %386 = vperm.xlu1 %525, %v376_v52  }
 0x1d6   : > { %v382_v53 = vpop.permute.xlu1 %381 }
 0x1d7   : > { %v389_v58 = vmul.f32 %v382_v53, %v377_v55 }
 0x1de   : > { %v387_v57 = vpop.permute.xlu1 %386 }
 0x1df   : > { %v390_v59 = vmul.f32 %v387_v57, %v378_v56 }
 0x1e1   : > { %v391_v60 = vadd.f32 %v390_v59, %v389_v58 }
 0x1e3   : > { %v392_v61 = vrot.slane %v391_v60, 4 }
 0x1e5   : > { %v393_v62 = vadd.f32 %v392_v61, %v391_v60 }
 0x1e7   : > { %v394_v63 = vrot.slane %v393_v62, 2 }
 0x1e9   : > { %v395_v0 = vadd.f32 %v394_v63, %v393_v62 }
 0x1eb   : > { %v396_v1 = vrot.slane %v395_v0, 1 }
 0x1ed   : > { %v397_v2 = vadd.f32 %v396_v1, %v395_v0 }
 0x1ef   : > { %398 = vst [vmem:[%s240_s27] sm:$0x1] %v397_v2 }
 0x1f0 PF: > { %s15_s18 = sadd.s32 1, %s545_s18  }
 0x1f1   : > { %p12_p4 = scmp.ge.s32.totalorder %s15_s18, 4  }
 0x1f3   :  { %14 = sbr.rel (!%p12_p4) target bundleno = 1 (0x1), region = 73 }

// kernel: _lambda_.43
= control target key start
LH: loop header
LB: loop body
LE: loop exit
PB: predicated region body
PF: predicated region fallthrough
CT: control target
= control target key end

     0   :  { %s208_s1 = inlined_call_operand.vmem [shape: bf16[128,128], index: 1, kind: input, shape index: {}]   ;;  %s209_s2 = inlined_call_operand.vmem [shape: f32[1,128], index: 2, kind: input, shape index: {}]   ;;  %s210_s0 = inlined_call_operand.vmem [shape: bf16[8,128], index: 0, kind: input, shape index: {}]   ;;  %s211_s3 = inlined_call_operand.vmem [shape: f32[8,128], index: 3, kind: output, shape index: {}]  }
   0x1   :  { %v153_v0 = vld [vmem:[%s208_s1 + $0x38] sm:$0xff]  ;;  %v152_v1 = vld [vmem:[%s208_s1 + $0x30] sm:$0xff]  ;;  %v151_v2 = vld [vmem:[%s208_s1 + $0x28] sm:$0xff] }
   0x2   :  { %85 = vmatpush.bf16.msra.mxu0 %v153_v0  ;;  %v150_v3 = vld [vmem:[%s208_s1 + $0x20] sm:$0xff]  ;;  %v149_v4 = vld [vmem:[%s208_s1 + $0x18] sm:$0xff]  ;;  %v148_v5 = vld [vmem:[%s208_s1 + $0x10] sm:$0xff] }
   0x3   :  { %v147_v6 = vld [vmem:[%s208_s1 + $0x8] sm:$0xff]  ;;  %v146_v7 = vld [vmem:[%s208_s1] sm:$0xff] }
   0x4   :  { %v20_v8 = vld [vmem:[%s210_s0] sm:$0xf] }
   0x5   :  { %v154_v9 = vld [vmem:[%s209_s2] ss:$0 sm:$0xff] }
   0x6   :  { %86 = vmatpush.bf16.msra.mxu0 %v152_v1 }
   0xa   :  { %87 = vmatpush.bf16.msra.mxu0 %v151_v2 }
   0xe   :  { %88 = vmatpush.bf16.msra.mxu0 %v150_v3 }
  0x12   :  { %89 = vmatpush.bf16.msra.mxu0 %v149_v4 }
  0x16   :  { %90 = vmatpush.bf16.msra.mxu0 %v148_v5 }
  0x1a   :  { %91 = vmatpush.bf16.msra.mxu0 %v147_v6 }
  0x1e   :  { %92 = vmatpush.bf16.msra.mxu0 %v146_v7 }
  0x21   :  { %93 = vmatmul.bf16.vlgmr.msra.gmra.mxu0 %v20_v8 }
  0x9e   :  { %v94_v10 = vpop.f32.mrf.mxu0 }
  0x9f   :  { %v108_v11 = vadd.f32 %v154_v9, %v94_v10 }
  0xa1   :  { %109 = vst [vmem:[%s211_s3] sm:$0xff] %v108_v11 }
  0xa6   :  { %v96_v12 = vpop.f32.mrf.mxu0 }

</bundles_post_ra>
